<compile_context>
chip_gen: v6e
topology: v6e:2x2x1
jax: 0.10.0
libtpu: 0.0.40
codegen_flags: <defaults>
</compile_context>

<pallas_src>
import math

import jax
import jax.numpy as jnp
from jax.experimental import pallas as pl
from jax.experimental.pallas import tpu as pltpu


def _cell(gates, c):
    """LSTM pointwise ops (f32).  Gate column order is [i, f, o, g]."""
    H = gates.shape[-1] // 4
    sig = jax.nn.sigmoid(gates[:, :3 * H])      # i, f, o in one EUP dispatch
    i = sig[:, 0:H]
    f = sig[:, H:2 * H]
    o = sig[:, 2 * H:3 * H]
    g = jnp.tanh(gates[:, 3 * H:])
    c_new = f * c + i * g
    h_new = o * jnp.tanh(c_new)
    return h_new, c_new


def _lstm_model_kernel(x_ref,                        # (T*Bp, Dp) time-major, padded
                       wx0_ref, bx0_ref,             # (Dp, 4H) f32, (1, 4H) f32 (linear_1 folded)
                       whh0_ref,                     # (H, 4H)  bf16
                       w1cat_ref, bx1_ref,           # (2H, 4H) bf16 = [wih1; whh1], (1, 4H) f32
                       w2_ref, b2_ref,               # (1, 2H), (1, 1)
                       out_ref,                      # (Bp, 1)
                       gx_ref):                      # scratch (T*Bp, 4H) f32
    Bp = out_ref.shape[0]
    H = whh0_ref.shape[0]
    T = x_ref.shape[0] // Bp

    # ---- layer-0 input projection: one batched MXU matmul over all T*Bp rows
    # (linear_1 already folded into wx0/bx0).  Off the recurrent critical path.
    gx_ref[...] = (jnp.dot(x_ref[...], wx0_ref[...],
                           preferred_element_type=jnp.float32) + bx0_ref[...])

    # ---- hoisted recurrent weights (bf16 MXU operands) ----
    whh0 = whh0_ref[...]                              # (H, 4H)  bf16
    w1cat = w1cat_ref[...]                            # (2H, 4H) bf16
    bx1 = bx1_ref[...]                                # (1, 4H)  f32

    h0 = jnp.zeros((Bp, H), jnp.float32)              # PyTorch zero init
    c0 = jnp.zeros((Bp, H), jnp.float32)
    h1 = jnp.zeros((Bp, H), jnp.float32)
    c1 = jnp.zeros((Bp, H), jnp.float32)

    # ---- wavefront-interleaved recurrence, fully unrolled (static slices;
    # layer-0's dot for step t+1 depends only on h0_t, so the scheduler can
    # overlap it with layer-1's pointwise work for step t).
    for t in range(T):
        # layer 0, timestep t: only h0 @ whh0 on the MXU (aligned gx slice)
        g0 = (gx_ref[pl.ds(t * Bp, Bp), :]
              + jnp.dot(h0.astype(jnp.bfloat16), whh0,
                        preferred_element_type=jnp.float32))
        h0, c0 = _cell(g0, c0)

        # layer 1, timestep t: fused input+recurrent dot, K = 2H = 128
        lhs1 = jnp.concatenate([h0, h1], axis=-1).astype(jnp.bfloat16)
        g1 = (jnp.dot(lhs1, w1cat, preferred_element_type=jnp.float32) + bx1)
        h1, c1 = _cell(g1, c1)

    # ---- head: h_n.permute(1,0,2).reshape(B, 2H) @ w2 + b2 (dropout p=0 is
    # identity).  VPU multiply + lane reduce instead of an N=1 MXU pass.
    w2 = w2_ref[...]                                  # (1, 2H)
    out_ref[...] = (jnp.sum(h0 * w2[:, :H], axis=-1, keepdims=True)
                    + jnp.sum(h1 * w2[:, H:], axis=-1, keepdims=True)
                    + b2_ref[...])


def _reorder_gates(w):
    """Permute gate blocks along the last dim: PyTorch [i,f,g,o] -> [i,f,o,g]."""
    i, f, g, o = jnp.split(w, 4, axis=-1)
    return jnp.concatenate([i, f, o, g], axis=-1)


def _round_up(n, m):
    return -(-n // m) * m


def fold_params(params):
    """One-time wrapper-side layout work (pure plumbing, outside the kernel):
    fold linear_1 into the layer-0 input projection, concatenate [wih1; whh1]
    for the fused layer-1 dot, reorder gate columns, pad Din, and cast the
    recurrent MXU weights to bf16 (f32 accumulation stays in the kernel)."""
    wx0 = params["w1"] @ params["wih0"]                    # (Din, 4H)
    bx0 = params["b1"] @ params["wih0"] + params["bg0"]    # (1, 4H)
    din = wx0.shape[0]
    dp = _round_up(din, 8)
    wx0 = jnp.pad(wx0, ((0, dp - din), (0, 0)))            # (Dp, 4H)
    w1cat = jnp.concatenate([params["wih1"], params["whh1"]], axis=0)  # (2H, 4H)
    return {
        "wx0":   _reorder_gates(wx0).astype(jnp.float32),
        "bx0":   _reorder_gates(bx0).astype(jnp.float32),
        "whh0":  _reorder_gates(params["whh0"]).astype(jnp.bfloat16),
        "w1cat": _reorder_gates(w1cat).astype(jnp.bfloat16),
        "bx1":   _reorder_gates(params["bg1"]).astype(jnp.float32),
        "w2row": params["w2"].T,                           # (1, 2H)
        "b2":    params["b2"],                             # (1, 1)
    }


def lstm_model_forward(x, folded):
    """x: (B, T, Din) batch-first, like the PyTorch module.  Returns (B,)."""
    B, T, din = x.shape
    H = folded["whh0"].shape[0]
    Bp = _round_up(B, 8)                  # sublane-align per-timestep slices
    Dp = folded["wx0"].shape[0]           # Din padded to a multiple of 8

    x_tm = jnp.transpose(x, (1, 0, 2))                         # (T, B, Din)
    x_tm = jnp.pad(x_tm, ((0, 0), (0, Bp - B), (0, Dp - din))) # (T, Bp, Dp)
    x_tm = x_tm.reshape(T * Bp, Dp)                            # time-major rows

    vmem = pl.BlockSpec(memory_space=pltpu.MemorySpace.VMEM)
    out = pl.pallas_call(
        _lstm_model_kernel,
        out_shape=jax.ShapeDtypeStruct((Bp, 1), jnp.float32),
        in_specs=[vmem] * 8,
        out_specs=vmem,
        scratch_shapes=[
            pltpu.VMEM((T * Bp, 4 * H), jnp.float32),   # layer-0 gates_x
        ],
    )(x_tm,
      folded["wx0"], folded["bx0"], folded["whh0"],
      folded["w1cat"], folded["bx1"],
      folded["w2row"], folded["b2"])
    # drop batch padding; predictions[:, -1] with output_size == 1 -> (B,)
    return out[:B, -1]


def init_params(key, din, hidden):
    """Deterministic synthetic params, PyTorch-style uniform(-1/sqrt(fan), ...).
    Stored in original PyTorch gate order [i,f,g,o]; folding/reorder/padding
    happens in fold_params()."""
    keys = jax.random.split(key, 12)

    def u(k, shape, bound):
        return jax.random.uniform(k, shape, jnp.float32, -bound, bound)

    b1 = 1.0 / math.sqrt(din)
    bh = 1.0 / math.sqrt(hidden)
    b2 = 1.0 / math.sqrt(2 * hidden)
    return {
        "w1":   u(keys[0], (din, hidden), b1),
        "b1":   u(keys[1], (1, hidden), b1),
        "wih0": u(keys[2], (hidden, 4 * hidden), bh),
        "whh0": u(keys[3], (hidden, 4 * hidden), bh),
        "bg0":  u(keys[4], (1, 4 * hidden), bh) + u(keys[5], (1, 4 * hidden), bh),
        "wih1": u(keys[6], (hidden, 4 * hidden), bh),
        "whh1": u(keys[7], (hidden, 4 * hidden), bh),
        "bg1":  u(keys[8], (1, 4 * hidden), bh) + u(keys[9], (1, 4 * hidden), bh),
        "w2":   u(keys[10], (2 * hidden, 1), b2),
        "b2":   u(keys[11], (1, 1), b2),
    }


def reference_forward(x, params):
    """Pure-JAX f32 reference of the PyTorch forward (unfolded weights, PyTorch
    gate order) for verification of the folded/reordered/bf16 kernel."""
    B, T, _ = x.shape
    H = params["w1"].shape[1]
    xp = jnp.einsum("btd,dh->bth", x, params["w1"]) + params["b1"][0]

    def run_layer(inp, wih, whh, bg):
        def step(carry, x_t):
            h, c = carry
            gates = x_t @ wih + h @ whh + bg
            i = jax.nn.sigmoid(gates[:, 0:H])
            f = jax.nn.sigmoid(gates[:, H:2 * H])
            g = jnp.tanh(gates[:, 2 * H:3 * H])
            o = jax.nn.sigmoid(gates[:, 3 * H:4 * H])
            c = f * c + i * g
            h = o * jnp.tanh(c)
            return (h, c), h

        init = (jnp.zeros((B, H), jnp.float32), jnp.zeros((B, H), jnp.float32))
        (h_f, _), hs = jax.lax.scan(step, init, jnp.transpose(inp, (1, 0, 2)))
        return jnp.transpose(hs, (1, 0, 2)), h_f

    out0, h0f = run_layer(xp, params["wih0"], params["whh0"], params["bg0"][0])
    _, h1f = run_layer(out0, params["wih1"], params["whh1"], params["bg1"][0])
    feat = jnp.concatenate([h0f, h1f], axis=-1)
    pred = feat @ params["w2"] + params["b2"]
    return pred[:, -1]


if __name__ == "__main__":
    key = jax.random.PRNGKey(0)
    B, T, Din, H = 4, 8, 5, 64          # num_layers fixed at 2 (as in the module)
    kx, kp = jax.random.split(key)
    x = jax.random.normal(kx, (B, T, Din), dtype=jnp.float32)
    params = init_params(kp, Din, H)
    folded = fold_params(params)

    out = lstm_model_forward(x, folded)
    jax.block_until_ready(out)

    ref = reference_forward(x, params)
    assert out.shape == (B,), out.shape
    # bf16 MXU operands on the recurrent dots (f32 accumulation) widen the
    # comparison budget slightly vs. the pure-f32 2e-3; 5e-3 is still tight.
    assert jnp.allclose(out, ref, atol=5e-3, rtol=5e-3), (out, ref)
    print("KERNEL_OK")
</pallas_src>

<mosaic_0001>
module attributes {stable_mosaic.version = 11 : i64} {
  func.func @_lstm_model_kernel(%arg0: memref<64x8xf32, #tpu.memory_space<vmem>>, %arg1: memref<8x256xf32, #tpu.memory_space<vmem>>, %arg2: memref<1x256xf32, #tpu.memory_space<vmem>>, %arg3: memref<64x256xbf16, #tpu.memory_space<vmem>>, %arg4: memref<128x256xbf16, #tpu.memory_space<vmem>>, %arg5: memref<1x256xf32, #tpu.memory_space<vmem>>, %arg6: memref<1x128xf32, #tpu.memory_space<vmem>>, %arg7: memref<1x1xf32, #tpu.memory_space<vmem>>, %arg8: memref<8x1xf32, #tpu.memory_space<vmem>>, %arg9: memref<64x256xf32, #tpu.memory_space<vmem>>) attributes {dimension_semantics = [], scalar_prefetch = 0 : i64, scratch_operands = 1 : i64, tpu.core_type = #tpu.core_type<tc>} {
    %c0 = arith.constant 0 : index
    %c0_0 = arith.constant 0 : index
    %0 = vector.load %arg0[%c0, %c0_0] : memref<64x8xf32, #tpu.memory_space<vmem>>, vector<64x8xf32>
    %c0_1 = arith.constant 0 : index
    %c0_2 = arith.constant 0 : index
    %1 = vector.load %arg1[%c0_1, %c0_2] : memref<8x256xf32, #tpu.memory_space<vmem>>, vector<8x256xf32>
    %cst = arith.constant dense<0.000000e+00> : vector<64x256xf32>
    %2 = tpu.matmul %0, %1, %cst {dimension_numbers = #tpu.dot_dimension_numbers<[1], [0], [0], [1], [0, 0, 1, 1], [], []>} : vector<64x8xf32>, vector<8x256xf32>, vector<64x256xf32> -> vector<64x256xf32>
    %c0_3 = arith.constant 0 : index
    %c0_4 = arith.constant 0 : index
    %3 = vector.load %arg2[%c0_3, %c0_4] : memref<1x256xf32, #tpu.memory_space<vmem>>, vector<1x256xf32>
    %4 = vector.broadcast %3 : vector<1x256xf32> to vector<64x256xf32>
    %5 = arith.addf %2, %4 : vector<64x256xf32>
    %c0_5 = arith.constant 0 : index
    %c0_6 = arith.constant 0 : index
    %6 = vector.load %arg9[%c0_5, %c0_6] : memref<64x256xf32, #tpu.memory_space<vmem>>, vector<64x256xf32>
    tpu.vector_store %arg9[%c0_5, %c0_6], %5 {strides = array<i32>} : memref<64x256xf32, #tpu.memory_space<vmem>>, vector<64x256xf32>,
    %c0_7 = arith.constant 0 : index
    %c0_8 = arith.constant 0 : index
    %7 = vector.load %arg3[%c0_7, %c0_8] : memref<64x256xbf16, #tpu.memory_space<vmem>>, vector<64x256xbf16>
    %c0_9 = arith.constant 0 : index
    %c0_10 = arith.constant 0 : index
    %8 = vector.load %arg4[%c0_9, %c0_10] : memref<128x256xbf16, #tpu.memory_space<vmem>>, vector<128x256xbf16>
    %c0_11 = arith.constant 0 : index
    %c0_12 = arith.constant 0 : index
    %9 = vector.load %arg5[%c0_11, %c0_12] : memref<1x256xf32, #tpu.memory_space<vmem>>, vector<1x256xf32>
    %cst_13 = arith.constant 0.000000e+00 : f32
    %10 = vector.broadcast %cst_13 : f32 to vector<8x64xf32>
    %cst_14 = arith.constant 0.000000e+00 : f32
    %11 = vector.broadcast %cst_14 : f32 to vector<8x64xf32>
    %cst_15 = arith.constant 0.000000e+00 : f32
    %12 = vector.broadcast %cst_15 : f32 to vector<8x64xf32>
    %cst_16 = arith.constant 0.000000e+00 : f32
    %13 = vector.broadcast %cst_16 : f32 to vector<8x64xf32>
    %c0_17 = arith.constant 0 : index
    %c0_18 = arith.constant 0 : index
    %14 = vector.load %arg9[%c0_17, %c0_18] : memref<64x256xf32, #tpu.memory_space<vmem>>, vector<8x256xf32>
    %15 = arith.truncf %10 : vector<8x64xf32> to vector<8x64xbf16>
    %cst_19 = arith.constant dense<0.000000e+00> : vector<8x256xf32>
    %16 = tpu.matmul %15, %7, %cst_19 {dimension_numbers = #tpu.dot_dimension_numbers<[1], [0], [0], [1], [0, 0, 1, 1], [], []>} : vector<8x64xbf16>, vector<64x256xbf16>, vector<8x256xf32> -> vector<8x256xf32>
    %17 = arith.addf %14, %16 : vector<8x256xf32>
    %18 = vector.extract_strided_slice %17 {offsets = [0, 0], sizes = [8, 192], strides = [1, 1]} : vector<8x256xf32> to vector<8x192xf32>
    %19 = arith.negf %18 : vector<8x192xf32>
    %20 = math.exp %19 : vector<8x192xf32>
    %cst_20 = arith.constant 1.000000e+00 : f32
    %21 = vector.broadcast %cst_20 : f32 to vector<8x192xf32>
    %22 = arith.addf %21, %20 : vector<8x192xf32>
    %23 = arith.divf %21, %22 : vector<8x192xf32>
    %24 = vector.extract_strided_slice %23 {offsets = [0, 0], sizes = [8, 64], strides = [1, 1]} : vector<8x192xf32> to vector<8x64xf32>
    %25 = vector.extract_strided_slice %23 {offsets = [0, 64], sizes = [8, 64], strides = [1, 1]} : vector<8x192xf32> to vector<8x64xf32>
    %26 = vector.extract_strided_slice %23 {offsets = [0, 128], sizes = [8, 64], strides = [1, 1]} : vector<8x192xf32> to vector<8x64xf32>
    %27 = vector.extract_strided_slice %17 {offsets = [0, 192], sizes = [8, 64], strides = [1, 1]} : vector<8x256xf32> to vector<8x64xf32>
    %28 = math.tanh %27 : vector<8x64xf32>
    %29 = arith.mulf %25, %11 : vector<8x64xf32>
    %30 = arith.mulf %24, %28 : vector<8x64xf32>
    %31 = arith.addf %29, %30 : vector<8x64xf32>
    %32 = math.tanh %31 : vector<8x64xf32>
    %33 = arith.mulf %26, %32 : vector<8x64xf32>
    %34 = tpu.concatenate %33, %12 in 1 : vector<8x64xf32>, vector<8x64xf32> -> vector<8x128xf32>
    %35 = arith.truncf %34 : vector<8x128xf32> to vector<8x128xbf16>
    %cst_21 = arith.constant dense<0.000000e+00> : vector<8x256xf32>
    %36 = tpu.matmul %35, %8, %cst_21 {dimension_numbers = #tpu.dot_dimension_numbers<[1], [0], [0], [1], [0, 0, 1, 1], [], []>} : vector<8x128xbf16>, vector<128x256xbf16>, vector<8x256xf32> -> vector<8x256xf32>
    %37 = vector.broadcast %9 : vector<1x256xf32> to vector<8x256xf32>
    %38 = arith.addf %36, %37 : vector<8x256xf32>
    %39 = vector.extract_strided_slice %38 {offsets = [0, 0], sizes = [8, 192], strides = [1, 1]} : vector<8x256xf32> to vector<8x192xf32>
    %40 = arith.negf %39 : vector<8x192xf32>
    %41 = math.exp %40 : vector<8x192xf32>
    %cst_22 = arith.constant 1.000000e+00 : f32
    %42 = vector.broadcast %cst_22 : f32 to vector<8x192xf32>
    %43 = arith.addf %42, %41 : vector<8x192xf32>
    %44 = arith.divf %42, %43 : vector<8x192xf32>
    %45 = vector.extract_strided_slice %44 {offsets = [0, 0], sizes = [8, 64], strides = [1, 1]} : vector<8x192xf32> to vector<8x64xf32>
    %46 = vector.extract_strided_slice %44 {offsets = [0, 64], sizes = [8, 64], strides = [1, 1]} : vector<8x192xf32> to vector<8x64xf32>
    %47 = vector.extract_strided_slice %44 {offsets = [0, 128], sizes = [8, 64], strides = [1, 1]} : vector<8x192xf32> to vector<8x64xf32>
    %48 = vector.extract_strided_slice %38 {offsets = [0, 192], sizes = [8, 64], strides = [1, 1]} : vector<8x256xf32> to vector<8x64xf32>
    %49 = math.tanh %48 : vector<8x64xf32>
    %50 = arith.mulf %46, %13 : vector<8x64xf32>
    %51 = arith.mulf %45, %49 : vector<8x64xf32>
    %52 = arith.addf %50, %51 : vector<8x64xf32>
    %53 = math.tanh %52 : vector<8x64xf32>
    %54 = arith.mulf %47, %53 : vector<8x64xf32>
    %c8 = arith.constant 8 : index
    %c0_23 = arith.constant 0 : index
    %55 = vector.load %arg9[%c8, %c0_23] : memref<64x256xf32, #tpu.memory_space<vmem>>, vector<8x256xf32>
    %56 = arith.truncf %33 : vector<8x64xf32> to vector<8x64xbf16>
    %cst_24 = arith.constant dense<0.000000e+00> : vector<8x256xf32>
    %57 = tpu.matmul %56, %7, %cst_24 {dimension_numbers = #tpu.dot_dimension_numbers<[1], [0], [0], [1], [0, 0, 1, 1], [], []>} : vector<8x64xbf16>, vector<64x256xbf16>, vector<8x256xf32> -> vector<8x256xf32>
    %58 = arith.addf %55, %57 : vector<8x256xf32>
    %59 = vector.extract_strided_slice %58 {offsets = [0, 0], sizes = [8, 192], strides = [1, 1]} : vector<8x256xf32> to vector<8x192xf32>
    %60 = arith.negf %59 : vector<8x192xf32>
    %61 = math.exp %60 : vector<8x192xf32>
    %cst_25 = arith.constant 1.000000e+00 : f32
    %62 = vector.broadcast %cst_25 : f32 to vector<8x192xf32>
    %63 = arith.addf %62, %61 : vector<8x192xf32>
    %64 = arith.divf %62, %63 : vector<8x192xf32>
    %65 = vector.extract_strided_slice %64 {offsets = [0, 0], sizes = [8, 64], strides = [1, 1]} : vector<8x192xf32> to vector<8x64xf32>
    %66 = vector.extract_strided_slice %64 {offsets = [0, 64], sizes = [8, 64], strides = [1, 1]} : vector<8x192xf32> to vector<8x64xf32>
    %67 = vector.extract_strided_slice %64 {offsets = [0, 128], sizes = [8, 64], strides = [1, 1]} : vector<8x192xf32> to vector<8x64xf32>
    %68 = vector.extract_strided_slice %58 {offsets = [0, 192], sizes = [8, 64], strides = [1, 1]} : vector<8x256xf32> to vector<8x64xf32>
    %69 = math.tanh %68 : vector<8x64xf32>
    %70 = arith.mulf %66, %31 : vector<8x64xf32>
    %71 = arith.mulf %65, %69 : vector<8x64xf32>
    %72 = arith.addf %70, %71 : vector<8x64xf32>
    %73 = math.tanh %72 : vector<8x64xf32>
    %74 = arith.mulf %67, %73 : vector<8x64xf32>
    %75 = tpu.concatenate %74, %54 in 1 : vector<8x64xf32>, vector<8x64xf32> -> vector<8x128xf32>
    %76 = arith.truncf %75 : vector<8x128xf32> to vector<8x128xbf16>
    %cst_26 = arith.constant dense<0.000000e+00> : vector<8x256xf32>
    %77 = tpu.matmul %76, %8, %cst_26 {dimension_numbers = #tpu.dot_dimension_numbers<[1], [0], [0], [1], [0, 0, 1, 1], [], []>} : vector<8x128xbf16>, vector<128x256xbf16>, vector<8x256xf32> -> vector<8x256xf32>
    %78 = vector.broadcast %9 : vector<1x256xf32> to vector<8x256xf32>
    %79 = arith.addf %77, %78 : vector<8x256xf32>
    %80 = vector.extract_strided_slice %79 {offsets = [0, 0], sizes = [8, 192], strides = [1, 1]} : vector<8x256xf32> to vector<8x192xf32>
    %81 = arith.negf %80 : vector<8x192xf32>
    %82 = math.exp %81 : vector<8x192xf32>
    %cst_27 = arith.constant 1.000000e+00 : f32
    %83 = vector.broadcast %cst_27 : f32 to vector<8x192xf32>
    %84 = arith.addf %83, %82 : vector<8x192xf32>
    %85 = arith.divf %83, %84 : vector<8x192xf32>
    %86 = vector.extract_strided_slice %85 {offsets = [0, 0], sizes = [8, 64], strides = [1, 1]} : vector<8x192xf32> to vector<8x64xf32>
    %87 = vector.extract_strided_slice %85 {offsets = [0, 64], sizes = [8, 64], strides = [1, 1]} : vector<8x192xf32> to vector<8x64xf32>
    %88 = vector.extract_strided_slice %85 {offsets = [0, 128], sizes = [8, 64], strides = [1, 1]} : vector<8x192xf32> to vector<8x64xf32>
    %89 = vector.extract_strided_slice %79 {offsets = [0, 192], sizes = [8, 64], strides = [1, 1]} : vector<8x256xf32> to vector<8x64xf32>
    %90 = math.tanh %89 : vector<8x64xf32>
    %91 = arith.mulf %87, %52 : vector<8x64xf32>
    %92 = arith.mulf %86, %90 : vector<8x64xf32>
    %93 = arith.addf %91, %92 : vector<8x64xf32>
    %94 = math.tanh %93 : vector<8x64xf32>
    %95 = arith.mulf %88, %94 : vector<8x64xf32>
    %c16 = arith.constant 16 : index
    %c0_28 = arith.constant 0 : index
    %96 = vector.load %arg9[%c16, %c0_28] : memref<64x256xf32, #tpu.memory_space<vmem>>, vector<8x256xf32>
    %97 = arith.truncf %74 : vector<8x64xf32> to vector<8x64xbf16>
    %cst_29 = arith.constant dense<0.000000e+00> : vector<8x256xf32>
    %98 = tpu.matmul %97, %7, %cst_29 {dimension_numbers = #tpu.dot_dimension_numbers<[1], [0], [0], [1], [0, 0, 1, 1], [], []>} : vector<8x64xbf16>, vector<64x256xbf16>, vector<8x256xf32> -> vector<8x256xf32>
    %99 = arith.addf %96, %98 : vector<8x256xf32>
    %100 = vector.extract_strided_slice %99 {offsets = [0, 0], sizes = [8, 192], strides = [1, 1]} : vector<8x256xf32> to vector<8x192xf32>
    %101 = arith.negf %100 : vector<8x192xf32>
    %102 = math.exp %101 : vector<8x192xf32>
    %cst_30 = arith.constant 1.000000e+00 : f32
    %103 = vector.broadcast %cst_30 : f32 to vector<8x192xf32>
    %104 = arith.addf %103, %102 : vector<8x192xf32>
    %105 = arith.divf %103, %104 : vector<8x192xf32>
    %106 = vector.extract_strided_slice %105 {offsets = [0, 0], sizes = [8, 64], strides = [1, 1]} : vector<8x192xf32> to vector<8x64xf32>
    %107 = vector.extract_strided_slice %105 {offsets = [0, 64], sizes = [8, 64], strides = [1, 1]} : vector<8x192xf32> to vector<8x64xf32>
    %108 = vector.extract_strided_slice %105 {offsets = [0, 128], sizes = [8, 64], strides = [1, 1]} : vector<8x192xf32> to vector<8x64xf32>
    %109 = vector.extract_strided_slice %99 {offsets = [0, 192], sizes = [8, 64], strides = [1, 1]} : vector<8x256xf32> to vector<8x64xf32>
    %110 = math.tanh %109 : vector<8x64xf32>
    %111 = arith.mulf %107, %72 : vector<8x64xf32>
    %112 = arith.mulf %106, %110 : vector<8x64xf32>
    %113 = arith.addf %111, %112 : vector<8x64xf32>
    %114 = math.tanh %113 : vector<8x64xf32>
    %115 = arith.mulf %108, %114 : vector<8x64xf32>
    %116 = tpu.concatenate %115, %95 in 1 : vector<8x64xf32>, vector<8x64xf32> -> vector<8x128xf32>
    %117 = arith.truncf %116 : vector<8x128xf32> to vector<8x128xbf16>
    %cst_31 = arith.constant dense<0.000000e+00> : vector<8x256xf32>
    %118 = tpu.matmul %117, %8, %cst_31 {dimension_numbers = #tpu.dot_dimension_numbers<[1], [0], [0], [1], [0, 0, 1, 1], [], []>} : vector<8x128xbf16>, vector<128x256xbf16>, vector<8x256xf32> -> vector<8x256xf32>
    %119 = vector.broadcast %9 : vector<1x256xf32> to vector<8x256xf32>
    %120 = arith.addf %118, %119 : vector<8x256xf32>
    %121 = vector.extract_strided_slice %120 {offsets = [0, 0], sizes = [8, 192], strides = [1, 1]} : vector<8x256xf32> to vector<8x192xf32>
    %122 = arith.negf %121 : vector<8x192xf32>
    %123 = math.exp %122 : vector<8x192xf32>
    %cst_32 = arith.constant 1.000000e+00 : f32
    %124 = vector.broadcast %cst_32 : f32 to vector<8x192xf32>
    %125 = arith.addf %124, %123 : vector<8x192xf32>
    %126 = arith.divf %124, %125 : vector<8x192xf32>
    %127 = vector.extract_strided_slice %126 {offsets = [0, 0], sizes = [8, 64], strides = [1, 1]} : vector<8x192xf32> to vector<8x64xf32>
    %128 = vector.extract_strided_slice %126 {offsets = [0, 64], sizes = [8, 64], strides = [1, 1]} : vector<8x192xf32> to vector<8x64xf32>
    %129 = vector.extract_strided_slice %126 {offsets = [0, 128], sizes = [8, 64], strides = [1, 1]} : vector<8x192xf32> to vector<8x64xf32>
    %130 = vector.extract_strided_slice %120 {offsets = [0, 192], sizes = [8, 64], strides = [1, 1]} : vector<8x256xf32> to vector<8x64xf32>
    %131 = math.tanh %130 : vector<8x64xf32>
    %132 = arith.mulf %128, %93 : vector<8x64xf32>
    %133 = arith.mulf %127, %131 : vector<8x64xf32>
    %134 = arith.addf %132, %133 : vector<8x64xf32>
    %135 = math.tanh %134 : vector<8x64xf32>
    %136 = arith.mulf %129, %135 : vector<8x64xf32>
    %c24 = arith.constant 24 : index
    %c0_33 = arith.constant 0 : index
    %137 = vector.load %arg9[%c24, %c0_33] : memref<64x256xf32, #tpu.memory_space<vmem>>, vector<8x256xf32>
    %138 = arith.truncf %115 : vector<8x64xf32> to vector<8x64xbf16>
    %cst_34 = arith.constant dense<0.000000e+00> : vector<8x256xf32>
    %139 = tpu.matmul %138, %7, %cst_34 {dimension_numbers = #tpu.dot_dimension_numbers<[1], [0], [0], [1], [0, 0, 1, 1], [], []>} : vector<8x64xbf16>, vector<64x256xbf16>, vector<8x256xf32> -> vector<8x256xf32>
    %140 = arith.addf %137, %139 : vector<8x256xf32>
    %141 = vector.extract_strided_slice %140 {offsets = [0, 0], sizes = [8, 192], strides = [1, 1]} : vector<8x256xf32> to vector<8x192xf32>
    %142 = arith.negf %141 : vector<8x192xf32>
    %143 = math.exp %142 : vector<8x192xf32>
    %cst_35 = arith.constant 1.000000e+00 : f32
    %144 = vector.broadcast %cst_35 : f32 to vector<8x192xf32>
    %145 = arith.addf %144, %143 : vector<8x192xf32>
    %146 = arith.divf %144, %145 : vector<8x192xf32>
    %147 = vector.extract_strided_slice %146 {offsets = [0, 0], sizes = [8, 64], strides = [1, 1]} : vector<8x192xf32> to vector<8x64xf32>
    %148 = vector.extract_strided_slice %146 {offsets = [0, 64], sizes = [8, 64], strides = [1, 1]} : vector<8x192xf32> to vector<8x64xf32>
    %149 = vector.extract_strided_slice %146 {offsets = [0, 128], sizes = [8, 64], strides = [1, 1]} : vector<8x192xf32> to vector<8x64xf32>
    %150 = vector.extract_strided_slice %140 {offsets = [0, 192], sizes = [8, 64], strides = [1, 1]} : vector<8x256xf32> to vector<8x64xf32>
    %151 = math.tanh %150 : vector<8x64xf32>
    %152 = arith.mulf %148, %113 : vector<8x64xf32>
    %153 = arith.mulf %147, %151 : vector<8x64xf32>
    %154 = arith.addf %152, %153 : vector<8x64xf32>
    %155 = math.tanh %154 : vector<8x64xf32>
    %156 = arith.mulf %149, %155 : vector<8x64xf32>
    %157 = tpu.concatenate %156, %136 in 1 : vector<8x64xf32>, vector<8x64xf32> -> vector<8x128xf32>
    %158 = arith.truncf %157 : vector<8x128xf32> to vector<8x128xbf16>
    %cst_36 = arith.constant dense<0.000000e+00> : vector<8x256xf32>
    %159 = tpu.matmul %158, %8, %cst_36 {dimension_numbers = #tpu.dot_dimension_numbers<[1], [0], [0], [1], [0, 0, 1, 1], [], []>} : vector<8x128xbf16>, vector<128x256xbf16>, vector<8x256xf32> -> vector<8x256xf32>
    %160 = vector.broadcast %9 : vector<1x256xf32> to vector<8x256xf32>
    %161 = arith.addf %159, %160 : vector<8x256xf32>
    %162 = vector.extract_strided_slice %161 {offsets = [0, 0], sizes = [8, 192], strides = [1, 1]} : vector<8x256xf32> to vector<8x192xf32>
    %163 = arith.negf %162 : vector<8x192xf32>
    %164 = math.exp %163 : vector<8x192xf32>
    %cst_37 = arith.constant 1.000000e+00 : f32
    %165 = vector.broadcast %cst_37 : f32 to vector<8x192xf32>
    %166 = arith.addf %165, %164 : vector<8x192xf32>
    %167 = arith.divf %165, %166 : vector<8x192xf32>
    %168 = vector.extract_strided_slice %167 {offsets = [0, 0], sizes = [8, 64], strides = [1, 1]} : vector<8x192xf32> to vector<8x64xf32>
    %169 = vector.extract_strided_slice %167 {offsets = [0, 64], sizes = [8, 64], strides = [1, 1]} : vector<8x192xf32> to vector<8x64xf32>
    %170 = vector.extract_strided_slice %167 {offsets = [0, 128], sizes = [8, 64], strides = [1, 1]} : vector<8x192xf32> to vector<8x64xf32>
    %171 = vector.extract_strided_slice %161 {offsets = [0, 192], sizes = [8, 64], strides = [1, 1]} : vector<8x256xf32> to vector<8x64xf32>
    %172 = math.tanh %171 : vector<8x64xf32>
    %173 = arith.mulf %169, %134 : vector<8x64xf32>
    %174 = arith.mulf %168, %172 : vector<8x64xf32>
    %175 = arith.addf %173, %174 : vector<8x64xf32>
    %176 = math.tanh %175 : vector<8x64xf32>
    %177 = arith.mulf %170, %176 : vector<8x64xf32>
    %c32 = arith.constant 32 : index
    %c0_38 = arith.constant 0 : index
    %178 = vector.load %arg9[%c32, %c0_38] : memref<64x256xf32, #tpu.memory_space<vmem>>, vector<8x256xf32>
    %179 = arith.truncf %156 : vector<8x64xf32> to vector<8x64xbf16>
    %cst_39 = arith.constant dense<0.000000e+00> : vector<8x256xf32>
    %180 = tpu.matmul %179, %7, %cst_39 {dimension_numbers = #tpu.dot_dimension_numbers<[1], [0], [0], [1], [0, 0, 1, 1], [], []>} : vector<8x64xbf16>, vector<64x256xbf16>, vector<8x256xf32> -> vector<8x256xf32>
    %181 = arith.addf %178, %180 : vector<8x256xf32>
    %182 = vector.extract_strided_slice %181 {offsets = [0, 0], sizes = [8, 192], strides = [1, 1]} : vector<8x256xf32> to vector<8x192xf32>
    %183 = arith.negf %182 : vector<8x192xf32>
    %184 = math.exp %183 : vector<8x192xf32>
    %cst_40 = arith.constant 1.000000e+00 : f32
    %185 = vector.broadcast %cst_40 : f32 to vector<8x192xf32>
    %186 = arith.addf %185, %184 : vector<8x192xf32>
    %187 = arith.divf %185, %186 : vector<8x192xf32>
    %188 = vector.extract_strided_slice %187 {offsets = [0, 0], sizes = [8, 64], strides = [1, 1]} : vector<8x192xf32> to vector<8x64xf32>
    %189 = vector.extract_strided_slice %187 {offsets = [0, 64], sizes = [8, 64], strides = [1, 1]} : vector<8x192xf32> to vector<8x64xf32>
    %190 = vector.extract_strided_slice %187 {offsets = [0, 128], sizes = [8, 64], strides = [1, 1]} : vector<8x192xf32> to vector<8x64xf32>
    %191 = vector.extract_strided_slice %181 {offsets = [0, 192], sizes = [8, 64], strides = [1, 1]} : vector<8x256xf32> to vector<8x64xf32>
    %192 = math.tanh %191 : vector<8x64xf32>
    %193 = arith.mulf %189, %154 : vector<8x64xf32>
    %194 = arith.mulf %188, %192 : vector<8x64xf32>
    %195 = arith.addf %193, %194 : vector<8x64xf32>
    %196 = math.tanh %195 : vector<8x64xf32>
    %197 = arith.mulf %190, %196 : vector<8x64xf32>
    %198 = tpu.concatenate %197, %177 in 1 : vector<8x64xf32>, vector<8x64xf32> -> vector<8x128xf32>
    %199 = arith.truncf %198 : vector<8x128xf32> to vector<8x128xbf16>
    %cst_41 = arith.constant dense<0.000000e+00> : vector<8x256xf32>
    %200 = tpu.matmul %199, %8, %cst_41 {dimension_numbers = #tpu.dot_dimension_numbers<[1], [0], [0], [1], [0, 0, 1, 1], [], []>} : vector<8x128xbf16>, vector<128x256xbf16>, vector<8x256xf32> -> vector<8x256xf32>
    %201 = vector.broadcast %9 : vector<1x256xf32> to vector<8x256xf32>
    %202 = arith.addf %200, %201 : vector<8x256xf32>
    %203 = vector.extract_strided_slice %202 {offsets = [0, 0], sizes = [8, 192], strides = [1, 1]} : vector<8x256xf32> to vector<8x192xf32>
    %204 = arith.negf %203 : vector<8x192xf32>
    %205 = math.exp %204 : vector<8x192xf32>
    %cst_42 = arith.constant 1.000000e+00 : f32
    %206 = vector.broadcast %cst_42 : f32 to vector<8x192xf32>
    %207 = arith.addf %206, %205 : vector<8x192xf32>
    %208 = arith.divf %206, %207 : vector<8x192xf32>
    %209 = vector.extract_strided_slice %208 {offsets = [0, 0], sizes = [8, 64], strides = [1, 1]} : vector<8x192xf32> to vector<8x64xf32>
    %210 = vector.extract_strided_slice %208 {offsets = [0, 64], sizes = [8, 64], strides = [1, 1]} : vector<8x192xf32> to vector<8x64xf32>
    %211 = vector.extract_strided_slice %208 {offsets = [0, 128], sizes = [8, 64], strides = [1, 1]} : vector<8x192xf32> to vector<8x64xf32>
    %212 = vector.extract_strided_slice %202 {offsets = [0, 192], sizes = [8, 64], strides = [1, 1]} : vector<8x256xf32> to vector<8x64xf32>
    %213 = math.tanh %212 : vector<8x64xf32>
    %214 = arith.mulf %210, %175 : vector<8x64xf32>
    %215 = arith.mulf %209, %213 : vector<8x64xf32>
    %216 = arith.addf %214, %215 : vector<8x64xf32>
    %217 = math.tanh %216 : vector<8x64xf32>
    %218 = arith.mulf %211, %217 : vector<8x64xf32>
    %c40 = arith.constant 40 : index
    %c0_43 = arith.constant 0 : index
    %219 = vector.load %arg9[%c40, %c0_43] : memref<64x256xf32, #tpu.memory_space<vmem>>, vector<8x256xf32>
    %220 = arith.truncf %197 : vector<8x64xf32> to vector<8x64xbf16>
    %cst_44 = arith.constant dense<0.000000e+00> : vector<8x256xf32>
    %221 = tpu.matmul %220, %7, %cst_44 {dimension_numbers = #tpu.dot_dimension_numbers<[1], [0], [0], [1], [0, 0, 1, 1], [], []>} : vector<8x64xbf16>, vector<64x256xbf16>, vector<8x256xf32> -> vector<8x256xf32>
    %222 = arith.addf %219, %221 : vector<8x256xf32>
    %223 = vector.extract_strided_slice %222 {offsets = [0, 0], sizes = [8, 192], strides = [1, 1]} : vector<8x256xf32> to vector<8x192xf32>
    %224 = arith.negf %223 : vector<8x192xf32>
    %225 = math.exp %224 : vector<8x192xf32>
    %cst_45 = arith.constant 1.000000e+00 : f32
    %226 = vector.broadcast %cst_45 : f32 to vector<8x192xf32>
    %227 = arith.addf %226, %225 : vector<8x192xf32>
    %228 = arith.divf %226, %227 : vector<8x192xf32>
    %229 = vector.extract_strided_slice %228 {offsets = [0, 0], sizes = [8, 64], strides = [1, 1]} : vector<8x192xf32> to vector<8x64xf32>
    %230 = vector.extract_strided_slice %228 {offsets = [0, 64], sizes = [8, 64], strides = [1, 1]} : vector<8x192xf32> to vector<8x64xf32>
    %231 = vector.extract_strided_slice %228 {offsets = [0, 128], sizes = [8, 64], strides = [1, 1]} : vector<8x192xf32> to vector<8x64xf32>
    %232 = vector.extract_strided_slice %222 {offsets = [0, 192], sizes = [8, 64], strides = [1, 1]} : vector<8x256xf32> to vector<8x64xf32>
    %233 = math.tanh %232 : vector<8x64xf32>
    %234 = arith.mulf %230, %195 : vector<8x64xf32>
    %235 = arith.mulf %229, %233 : vector<8x64xf32>
    %236 = arith.addf %234, %235 : vector<8x64xf32>
    %237 = math.tanh %236 : vector<8x64xf32>
    %238 = arith.mulf %231, %237 : vector<8x64xf32>
    %239 = tpu.concatenate %238, %218 in 1 : vector<8x64xf32>, vector<8x64xf32> -> vector<8x128xf32>
    %240 = arith.truncf %239 : vector<8x128xf32> to vector<8x128xbf16>
    %cst_46 = arith.constant dense<0.000000e+00> : vector<8x256xf32>
    %241 = tpu.matmul %240, %8, %cst_46 {dimension_numbers = #tpu.dot_dimension_numbers<[1], [0], [0], [1], [0, 0, 1, 1], [], []>} : vector<8x128xbf16>, vector<128x256xbf16>, vector<8x256xf32> -> vector<8x256xf32>
    %242 = vector.broadcast %9 : vector<1x256xf32> to vector<8x256xf32>
    %243 = arith.addf %241, %242 : vector<8x256xf32>
    %244 = vector.extract_strided_slice %243 {offsets = [0, 0], sizes = [8, 192], strides = [1, 1]} : vector<8x256xf32> to vector<8x192xf32>
    %245 = arith.negf %244 : vector<8x192xf32>
    %246 = math.exp %245 : vector<8x192xf32>
    %cst_47 = arith.constant 1.000000e+00 : f32
    %247 = vector.broadcast %cst_47 : f32 to vector<8x192xf32>
    %248 = arith.addf %247, %246 : vector<8x192xf32>
    %249 = arith.divf %247, %248 : vector<8x192xf32>
    %250 = vector.extract_strided_slice %249 {offsets = [0, 0], sizes = [8, 64], strides = [1, 1]} : vector<8x192xf32> to vector<8x64xf32>
    %251 = vector.extract_strided_slice %249 {offsets = [0, 64], sizes = [8, 64], strides = [1, 1]} : vector<8x192xf32> to vector<8x64xf32>
    %252 = vector.extract_strided_slice %249 {offsets = [0, 128], sizes = [8, 64], strides = [1, 1]} : vector<8x192xf32> to vector<8x64xf32>
    %253 = vector.extract_strided_slice %243 {offsets = [0, 192], sizes = [8, 64], strides = [1, 1]} : vector<8x256xf32> to vector<8x64xf32>
    %254 = math.tanh %253 : vector<8x64xf32>
    %255 = arith.mulf %251, %216 : vector<8x64xf32>
    %256 = arith.mulf %250, %254 : vector<8x64xf32>
    %257 = arith.addf %255, %256 : vector<8x64xf32>
    %258 = math.tanh %257 : vector<8x64xf32>
    %259 = arith.mulf %252, %258 : vector<8x64xf32>
    %c48 = arith.constant 48 : index
    %c0_48 = arith.constant 0 : index
    %260 = vector.load %arg9[%c48, %c0_48] : memref<64x256xf32, #tpu.memory_space<vmem>>, vector<8x256xf32>
    %261 = arith.truncf %238 : vector<8x64xf32> to vector<8x64xbf16>
    %cst_49 = arith.constant dense<0.000000e+00> : vector<8x256xf32>
    %262 = tpu.matmul %261, %7, %cst_49 {dimension_numbers = #tpu.dot_dimension_numbers<[1], [0], [0], [1], [0, 0, 1, 1], [], []>} : vector<8x64xbf16>, vector<64x256xbf16>, vector<8x256xf32> -> vector<8x256xf32>
    %263 = arith.addf %260, %262 : vector<8x256xf32>
    %264 = vector.extract_strided_slice %263 {offsets = [0, 0], sizes = [8, 192], strides = [1, 1]} : vector<8x256xf32> to vector<8x192xf32>
    %265 = arith.negf %264 : vector<8x192xf32>
    %266 = math.exp %265 : vector<8x192xf32>
    %cst_50 = arith.constant 1.000000e+00 : f32
    %267 = vector.broadcast %cst_50 : f32 to vector<8x192xf32>
    %268 = arith.addf %267, %266 : vector<8x192xf32>
    %269 = arith.divf %267, %268 : vector<8x192xf32>
    %270 = vector.extract_strided_slice %269 {offsets = [0, 0], sizes = [8, 64], strides = [1, 1]} : vector<8x192xf32> to vector<8x64xf32>
    %271 = vector.extract_strided_slice %269 {offsets = [0, 64], sizes = [8, 64], strides = [1, 1]} : vector<8x192xf32> to vector<8x64xf32>
    %272 = vector.extract_strided_slice %269 {offsets = [0, 128], sizes = [8, 64], strides = [1, 1]} : vector<8x192xf32> to vector<8x64xf32>
    %273 = vector.extract_strided_slice %263 {offsets = [0, 192], sizes = [8, 64], strides = [1, 1]} : vector<8x256xf32> to vector<8x64xf32>
    %274 = math.tanh %273 : vector<8x64xf32>
    %275 = arith.mulf %271, %236 : vector<8x64xf32>
    %276 = arith.mulf %270, %274 : vector<8x64xf32>
    %277 = arith.addf %275, %276 : vector<8x64xf32>
    %278 = math.tanh %277 : vector<8x64xf32>
    %279 = arith.mulf %272, %278 : vector<8x64xf32>
    %280 = tpu.concatenate %279, %259 in 1 : vector<8x64xf32>, vector<8x64xf32> -> vector<8x128xf32>
    %281 = arith.truncf %280 : vector<8x128xf32> to vector<8x128xbf16>
    %cst_51 = arith.constant dense<0.000000e+00> : vector<8x256xf32>
    %282 = tpu.matmul %281, %8, %cst_51 {dimension_numbers = #tpu.dot_dimension_numbers<[1], [0], [0], [1], [0, 0, 1, 1], [], []>} : vector<8x128xbf16>, vector<128x256xbf16>, vector<8x256xf32> -> vector<8x256xf32>
    %283 = vector.broadcast %9 : vector<1x256xf32> to vector<8x256xf32>
    %284 = arith.addf %282, %283 : vector<8x256xf32>
    %285 = vector.extract_strided_slice %284 {offsets = [0, 0], sizes = [8, 192], strides = [1, 1]} : vector<8x256xf32> to vector<8x192xf32>
    %286 = arith.negf %285 : vector<8x192xf32>
    %287 = math.exp %286 : vector<8x192xf32>
    %cst_52 = arith.constant 1.000000e+00 : f32
    %288 = vector.broadcast %cst_52 : f32 to vector<8x192xf32>
    %289 = arith.addf %288, %287 : vector<8x192xf32>
    %290 = arith.divf %288, %289 : vector<8x192xf32>
    %291 = vector.extract_strided_slice %290 {offsets = [0, 0], sizes = [8, 64], strides = [1, 1]} : vector<8x192xf32> to vector<8x64xf32>
    %292 = vector.extract_strided_slice %290 {offsets = [0, 64], sizes = [8, 64], strides = [1, 1]} : vector<8x192xf32> to vector<8x64xf32>
    %293 = vector.extract_strided_slice %290 {offsets = [0, 128], sizes = [8, 64], strides = [1, 1]} : vector<8x192xf32> to vector<8x64xf32>
    %294 = vector.extract_strided_slice %284 {offsets = [0, 192], sizes = [8, 64], strides = [1, 1]} : vector<8x256xf32> to vector<8x64xf32>
    %295 = math.tanh %294 : vector<8x64xf32>
    %296 = arith.mulf %292, %257 : vector<8x64xf32>
    %297 = arith.mulf %291, %295 : vector<8x64xf32>
    %298 = arith.addf %296, %297 : vector<8x64xf32>
    %299 = math.tanh %298 : vector<8x64xf32>
    %300 = arith.mulf %293, %299 : vector<8x64xf32>
    %c56 = arith.constant 56 : index
    %c0_53 = arith.constant 0 : index
    %301 = vector.load %arg9[%c56, %c0_53] : memref<64x256xf32, #tpu.memory_space<vmem>>, vector<8x256xf32>
    %302 = arith.truncf %279 : vector<8x64xf32> to vector<8x64xbf16>
    %cst_54 = arith.constant dense<0.000000e+00> : vector<8x256xf32>
    %303 = tpu.matmul %302, %7, %cst_54 {dimension_numbers = #tpu.dot_dimension_numbers<[1], [0], [0], [1], [0, 0, 1, 1], [], []>} : vector<8x64xbf16>, vector<64x256xbf16>, vector<8x256xf32> -> vector<8x256xf32>
    %304 = arith.addf %301, %303 : vector<8x256xf32>
    %305 = vector.extract_strided_slice %304 {offsets = [0, 0], sizes = [8, 192], strides = [1, 1]} : vector<8x256xf32> to vector<8x192xf32>
    %306 = arith.negf %305 : vector<8x192xf32>
    %307 = math.exp %306 : vector<8x192xf32>
    %cst_55 = arith.constant 1.000000e+00 : f32
    %308 = vector.broadcast %cst_55 : f32 to vector<8x192xf32>
    %309 = arith.addf %308, %307 : vector<8x192xf32>
    %310 = arith.divf %308, %309 : vector<8x192xf32>
    %311 = vector.extract_strided_slice %310 {offsets = [0, 0], sizes = [8, 64], strides = [1, 1]} : vector<8x192xf32> to vector<8x64xf32>
    %312 = vector.extract_strided_slice %310 {offsets = [0, 64], sizes = [8, 64], strides = [1, 1]} : vector<8x192xf32> to vector<8x64xf32>
    %313 = vector.extract_strided_slice %310 {offsets = [0, 128], sizes = [8, 64], strides = [1, 1]} : vector<8x192xf32> to vector<8x64xf32>
    %314 = vector.extract_strided_slice %304 {offsets = [0, 192], sizes = [8, 64], strides = [1, 1]} : vector<8x256xf32> to vector<8x64xf32>
    %315 = math.tanh %314 : vector<8x64xf32>
    %316 = arith.mulf %312, %277 : vector<8x64xf32>
    %317 = arith.mulf %311, %315 : vector<8x64xf32>
    %318 = arith.addf %316, %317 : vector<8x64xf32>
    %319 = math.tanh %318 : vector<8x64xf32>
    %320 = arith.mulf %313, %319 : vector<8x64xf32>
    %321 = tpu.concatenate %320, %300 in 1 : vector<8x64xf32>, vector<8x64xf32> -> vector<8x128xf32>
    %322 = arith.truncf %321 : vector<8x128xf32> to vector<8x128xbf16>
    %cst_56 = arith.constant dense<0.000000e+00> : vector<8x256xf32>
    %323 = tpu.matmul %322, %8, %cst_56 {dimension_numbers = #tpu.dot_dimension_numbers<[1], [0], [0], [1], [0, 0, 1, 1], [], []>} : vector<8x128xbf16>, vector<128x256xbf16>, vector<8x256xf32> -> vector<8x256xf32>
    %324 = vector.broadcast %9 : vector<1x256xf32> to vector<8x256xf32>
    %325 = arith.addf %323, %324 : vector<8x256xf32>
    %326 = vector.extract_strided_slice %325 {offsets = [0, 0], sizes = [8, 192], strides = [1, 1]} : vector<8x256xf32> to vector<8x192xf32>
    %327 = arith.negf %326 : vector<8x192xf32>
    %328 = math.exp %327 : vector<8x192xf32>
    %cst_57 = arith.constant 1.000000e+00 : f32
    %329 = vector.broadcast %cst_57 : f32 to vector<8x192xf32>
    %330 = arith.addf %329, %328 : vector<8x192xf32>
    %331 = arith.divf %329, %330 : vector<8x192xf32>
    %332 = vector.extract_strided_slice %331 {offsets = [0, 0], sizes = [8, 64], strides = [1, 1]} : vector<8x192xf32> to vector<8x64xf32>
    %333 = vector.extract_strided_slice %331 {offsets = [0, 64], sizes = [8, 64], strides = [1, 1]} : vector<8x192xf32> to vector<8x64xf32>
    %334 = vector.extract_strided_slice %331 {offsets = [0, 128], sizes = [8, 64], strides = [1, 1]} : vector<8x192xf32> to vector<8x64xf32>
    %335 = vector.extract_strided_slice %325 {offsets = [0, 192], sizes = [8, 64], strides = [1, 1]} : vector<8x256xf32> to vector<8x64xf32>
    %336 = math.tanh %335 : vector<8x64xf32>
    %337 = arith.mulf %333, %298 : vector<8x64xf32>
    %338 = arith.mulf %332, %336 : vector<8x64xf32>
    %339 = arith.addf %337, %338 : vector<8x64xf32>
    %340 = math.tanh %339 : vector<8x64xf32>
    %341 = arith.mulf %334, %340 : vector<8x64xf32>
    %c0_58 = arith.constant 0 : index
    %c0_59 = arith.constant 0 : index
    %342 = vector.load %arg6[%c0_58, %c0_59] : memref<1x128xf32, #tpu.memory_space<vmem>>, vector<1x128xf32>
    %343 = vector.extract_strided_slice %342 {offsets = [0, 0], sizes = [1, 64], strides = [1, 1]} : vector<1x128xf32> to vector<1x64xf32>
    %344 = vector.broadcast %343 : vector<1x64xf32> to vector<8x64xf32>
    %345 = arith.mulf %320, %344 : vector<8x64xf32>
    %cst_60 = arith.constant dense<0.000000e+00> : vector<8xf32>
    %346 = vector.multi_reduction <add>, %345, %cst_60 [1] : vector<8x64xf32> to vector<8xf32>
    %347 = vector.shape_cast %346 : vector<8xf32> to vector<8x1xf32>
    %348 = vector.extract_strided_slice %342 {offsets = [0, 64], sizes = [1, 64], strides = [1, 1]} : vector<1x128xf32> to vector<1x64xf32>
    %349 = vector.broadcast %348 : vector<1x64xf32> to vector<8x64xf32>
    %350 = arith.mulf %341, %349 : vector<8x64xf32>
    %cst_61 = arith.constant dense<0.000000e+00> : vector<8xf32>
    %351 = vector.multi_reduction <add>, %350, %cst_61 [1] : vector<8x64xf32> to vector<8xf32>
    %352 = vector.shape_cast %351 : vector<8xf32> to vector<8x1xf32>
    %353 = arith.addf %347, %352 : vector<8x1xf32>
    %c0_62 = arith.constant 0 : index
    %c0_63 = arith.constant 0 : index
    %354 = vector.load %arg7[%c0_62, %c0_63] : memref<1x1xf32, #tpu.memory_space<vmem>>, vector<1x1xf32>
    %355 = vector.broadcast %354 : vector<1x1xf32> to vector<8x1xf32>
    %356 = arith.addf %353, %355 : vector<8x1xf32>
    %c0_64 = arith.constant 0 : index
    %c0_65 = arith.constant 0 : index
    %357 = vector.load %arg8[%c0_64, %c0_65] : memref<8x1xf32, #tpu.memory_space<vmem>>, vector<8x1xf32>
    tpu.vector_store %arg8[%c0_64, %c0_65], %356 {strides = array<i32>} : memref<8x1xf32, #tpu.memory_space<vmem>>, vector<8x1xf32>,
    return
  }
}

</mosaic_0001>

<bundles_post_ra>
// kernel: tpu_custom_call.1
= control target key start
LH: loop header
LB: loop body
LE: loop exit
PB: predicated region body
PF: predicated region fallthrough
CT: control target
= control target key end

     0   :  { %s2745_s0 = inlined_call_operand.vmem [shape: f32[64,8], index: 0, kind: input, shape index: {}]   ;;  %s2746_s1 = inlined_call_operand.hbm [shape: f32[8,256], index: 1, kind: input, shape index: {}]   ;;  %s2747_s2 = inlined_call_operand.vmem [shape: f32[1,256], index: 2, kind: input, shape index: {}]   ;;  %s2748_s3 = inlined_call_operand.vmem [shape: bf16[64,256], index: 3, kind: input, shape index: {}]   ;;  %s2749_s4 = inlined_call_operand.hbm [shape: bf16[128,256], index: 4, kind: input, shape index: {}]   ;;  %s2750_s5 = inlined_call_operand.vmem [shape: f32[1,256], index: 5, kind: input, shape index: {}]   ;;  %s2751_s6 = inlined_call_operand.vmem [shape: f32[1,128], index: 6, kind: input, shape index: {}]   ;;  %s2752_s7 = inlined_call_operand.<no memory space> [shape: f32[1,1], index: 7, kind: input, shape index: {}]   ;;  %s2753_s8 = inlined_call_operand.vmem [shape: f32[8,1], index: 8, kind: output, shape index: {}]  }
   0x1   :  { %v13_v0 = vstv %s2752_s7 }
   0x2   :  { %14 = vst [vmem:[#allocation3] sm:$0x1] %v13_v0 }
   0x3   :  { %15 = vsyncpa [#allocation5], 0 }
   0x4   :  { %16 = vsyncpa [#allocation7], 0  ;;  %s2048_s29 = smov [#allocation4]   ;;  %s2049_s9 = smov [#allocation6]  }
   0x5   :  { %s25_s30 = sshll.u32 %s2048_s29, 4  ;;  %s38_s10 = sshll.u32 %s2049_s9, 4  ;;  %s26_s30 = int_to_ptr.vmem [resolvable:$true] %s25_s30  ;;  %s39_s10 = int_to_ptr.vmem [resolvable:$true] %s38_s10 }
   0x6   :  { %s2012_s11 = scalar_lea.vmem %s26_s30, 256  ;;  %p2017_p1 = scmp.lt.s32.totalorder %s26_s30, %s26_s30 }
   0x7   :  { %p2013_p0 = scmp.ne.s32.totalorder %s26_s30, %s2012_s11  ;;  %p2018_p2 = scmp.lt.s32.totalorder %s2012_s11, %s2012_s11 }
   0x9   :  { %p2019_p3 = por %p2018_p2, %p2017_p1 }
   0xb   :  { %p2020_p4 = pnand %p2019_p3, %p2013_p0 }
   0xd   :  { %2023 = shalt.err (!%p2020_p4)
}
   0xe   :  { %28 = dma.hbm_to_vmem [thread:$0]  %s2746_s1, 256, %s26_s30, [#allocation5]  }
   0xf   :  { %s2032_s7 = scalar_lea.vmem %s39_s10, 2048  ;;  %p2037_p6 = scmp.lt.s32.totalorder %s39_s10, %s39_s10 }
  0x10   :  { %p2033_p5 = scmp.ne.s32.totalorder %s39_s10, %s2032_s7  ;;  %p2038_p7 = scmp.lt.s32.totalorder %s2032_s7, %s2032_s7 }
  0x12   :  { %p2039_p8 = por %p2038_p7, %p2037_p6 }
  0x14   :  { %p2040_p9 = pnand %p2039_p8, %p2033_p5 }
  0x16   :  { %2043 = shalt.err (!%p2040_p9)
}
  0x17   :  { %s2050_s14 = smov 128   ;;  %s2051_s15 = smov 8  }
  0x18   :  { %44 = dma.hbm_to_vmem [thread:$0]  %s2749_s4, 2048, %s39_s10, [#allocation7], %s2050_s14, %s2050_s14, %s2051_s15  }
  0x19   :  { %2044 = dma.done.wait [#allocation5], 256  }
  0x1a   :  { %2045 = vsyncadd [#allocation5], 4294967040 }
  0x1b   :  { %2046 = dma.done.wait [#allocation7], 2048  }
  0x1c   :  { %2047 = vsyncadd [#allocation7], 4294965248  ;;  %v2052_v1 = vmov 0.0   ;;  %v2053_v2 = vmov 0   ;;  %v2114_v3 = vld [vmem:[%s2748_s3 + $0x34] ss:$8 sps:$4 sm:$0xff]   ;;  %v70_v14 = vlaneseq }
  0x1d   :  { %169 = vmatprep.mubr.f32.mxu0 %v2052_v1  ;;  %337 = vmatprep.mubr.bf16.mxu1 %v2053_v2  ;;  %v2119_v4 = vld [vmem:[%s2748_s3 + $0x30] ss:$8 sps:$4 sm:$0xff]   ;;  %v2125_v5 = vld [vmem:[%s2748_s3 + $0x24] ss:$8 sps:$4 sm:$0xff]   ;;  %v2131_v6 = vld [vmem:[%s2748_s3 + $0x20] ss:$8 sps:$4 sm:$0xff]  }
  0x1e   :  { %313 = vmatprep.subr.bf16.mxu1 %v2114_v3  ;;  %v2136_v7 = vld [vmem:[%s2748_s3 + $0x14] ss:$8 sps:$4 sm:$0xff]   ;;  %v67_v8 = vld [vmem:[#allocation4 + $0x8] sm:$0xff]  ;;  %v66_v9 = vld [vmem:[#allocation4] sm:$0xff]  ;;  %vm80_vm0 = vcmask 64512   ;;  %v2166_v15 = vshrl.u32 %v70_v14, 7 }
  0x1f   :  { %314 = vmatpush1.bf16.msra.mxu1 %v2119_v4  ;;  %v58_v10 = vld [vmem:[%s2745_s0] sm:$0xff]  ;;  %135 = vmatprep.subr.mxu0 %v67_v8  ;;  %v2145_v11 = vld [vmem:[%s2748_s3 + $0x10] ss:$8 sps:$4 sm:$0xff]   ;;  %v59_v40 = vld [vmem:[%s2745_s0 + $0x8] sm:$0xff]  ;;  %vm301_vm1 = vcmask 523264   ;;  %vm1661_vm3 = vcmask 7168  }
  0x20   :  { %315 = vmatprep.subr.bf16.mxu1 %v2125_v5  ;;  %136 = vmatpush1.msra.mxu0 %v66_v9  ;;  %v2150_v12 = vld [vmem:[%s2748_s3 + $0x4] ss:$8 sps:$4 sm:$0xff]   ;;  %v2159_v13 = vld [vmem:[%s2748_s3] ss:$8 sps:$4 sm:$0xff]   ;;  %v72_v16 = vsub.s32 0, %v2166_v15  ;;  %v76_v19 = vsub.s32 1, %v2166_v15  ;;  %vm1703_vm2 = vmpackc.low %vm301_vm1, %vm301_vm1 }
  0x21   :  { %1669 = vmatmul.mubr.msk.f32.vlgmr.msra.gmra.mxu0 %vm80_vm0, %v58_v10  ;;  %v68_v17 = vld [vmem:[%s2747_s2] sm:$0x3]  ;;  %s2054_s2 = smov 64   ;;  %v2191_v38 = vld [vmem:[#allocation6 + $0x74] ss:$8 sps:$4 sm:$0xff]   ;;  %v61_v45 = vld [vmem:[%s2745_s0 + $0x18] sm:$0xff] }
  0x22   :  { %175 = vmatprep.mubr.f32.mxu0 %v2052_v1  ;;  %v2174_v18 = vrot.slane %v68_v17, %v72_v16  ;;  %v2180_v22 = vrot.slane %v68_v17, %v76_v19  ;;  %v2193_v39 = vld [vmem:[#allocation6 + $0x70] ss:$8 sps:$4 sm:$0xff]   ;;  %v2199_v41 = vld [vmem:[#allocation6 + $0x64] ss:$8 sps:$4 sm:$0xff]   ;;  %471 = vmatprep.subr.bf16.mxu0 %v2191_v38  ;;  %v2207_v43 = vld [vmem:[#allocation6 + $0x60] ss:$8 sps:$4 sm:$0xff]  }
  0x23   :  { %316 = vmatpush1.bf16.msra.mxu1 %v2131_v6  ;;  %v60_v42 = vld [vmem:[%s2745_s0 + $0x10] sm:$0xff]  ;;  %472 = vmatpush1.bf16.msra.mxu0 %v2193_v39  ;;  %v2221_v46 = vld [vmem:[#allocation6 + $0x50] ss:$8 sps:$4 sm:$0xff]   ;;  %v65_v57 = vld [vmem:[%s2745_s0 + $0x38] sm:$0xff] }
  0x24   :  { %317 = vmatprep.subr.bf16.mxu1 %v2136_v7  ;;  %473 = vmatprep.subr.bf16.mxu0 %v2199_v41  ;;  %v2211_v44 = vld [vmem:[#allocation6 + $0x54] ss:$8 sps:$4 sm:$0xff]   ;;  %v2224_v47 = vld [vmem:[#allocation6 + $0x44] ss:$8 sps:$4 sm:$0xff]   ;;  %v2234_v49 = vld [vmem:[#allocation6 + $0x40] ss:$8 sps:$4 sm:$0xff]  }
  0x25   :  { %1670 = vmatmul.mubr.msk.f32.gmra.mxu0 %vm80_vm0, %v59_v40  ;;  %v62_v48 = vld [vmem:[%s2745_s0 + $0x20] sm:$0xff]  ;;  %v63_v51 = vld [vmem:[%s2745_s0 + $0x28] sm:$0xff]  ;;  %v64_v54 = vld [vmem:[%s2745_s0 + $0x30] sm:$0xff] }
  0x26   :  { %181 = vmatprep.mubr.f32.mxu0 %v2052_v1  ;;  %v2237_v50 = vld [vmem:[#allocation6 + $0x34] ss:$8 sps:$4 sm:$0xff]   ;;  %v2247_v52 = vld [vmem:[#allocation6 + $0x30] ss:$8 sps:$4 sm:$0xff]   ;;  %v2250_v53 = vld [vmem:[#allocation6 + $0x24] ss:$8 sps:$4 sm:$0xff]  }
  0x27   :  { %318 = vmatpush1.bf16.msra.mxu1 %v2145_v11  ;;  %474 = vmatpush1.bf16.msra.mxu0 %v2207_v43  ;;  %v2260_v55 = vld [vmem:[#allocation6 + $0x20] ss:$8 sps:$4 sm:$0xff]   ;;  %v2263_v56 = vld [vmem:[#allocation6 + $0x14] ss:$8 sps:$4 sm:$0xff]   ;;  %v2273_v58 = vld [vmem:[#allocation6 + $0x10] ss:$8 sps:$4 sm:$0xff]  }
  0x28   :  { %319 = vmatprep.subr.bf16.mxu1 %v2150_v12  ;;  %475 = vmatprep.subr.bf16.mxu0 %v2211_v44  ;;  %v2276_v59 = vld [vmem:[#allocation6 + $0x4] ss:$8 sps:$4 sm:$0xff]   ;;  %v2289_v63 = vld [vmem:[#allocation6] ss:$8 sps:$4 sm:$0xff]  }
  0x29   :  { %1671 = vmatmul.mubr.msk.f32.gmra.mxu0 %vm80_vm0, %v60_v42 }
  0x2a   :  { %187 = vmatprep.mubr.f32.mxu0 %v2052_v1 }
  0x2b   :  { %320 = vmatpush1.bf16.msra.mxu1 %v2159_v13  ;;  %476 = vmatpush1.bf16.msra.mxu0 %v2221_v46 }
  0x2c   :  { %627 = vmatprep.subr.bf16.mxu1 %v2191_v38  ;;  %477 = vmatprep.subr.bf16.mxu0 %v2224_v47 }
  0x2d   :  { %1672 = vmatmul.mubr.msk.f32.gmra.mxu0 %vm80_vm0, %v61_v45 }
  0x2e   :  { %338 = vmatmul.mubr.bf16.vlgmr.msra.gmra.mxu1 %v2053_v2  ;;  %193 = vmatprep.mubr.f32.mxu0 %v2052_v1 }
  0x2f   :  { %659 = vmatprep.mubr.bf16.mxu1 %v2053_v2  ;;  %628 = vmatpush1.bf16.msra.mxu1 %v2193_v39 }
  0x30   :  { %629 = vmatprep.subr.bf16.mxu1 %v2199_v41  ;;  %478 = vmatpush1.bf16.msra.mxu0 %v2234_v49 }
  0x31   :  { %1673 = vmatmul.mubr.msk.f32.gmra.mxu0 %vm80_vm0, %v62_v48  ;;  %479 = vmatprep.subr.bf16.mxu0 %v2237_v50 }
  0x32   :  { %199 = vmatprep.mubr.f32.mxu0 %v2052_v1 }
  0x33   :  { %630 = vmatpush1.bf16.msra.mxu1 %v2207_v43 }
  0x34   :  { %631 = vmatprep.subr.bf16.mxu1 %v2211_v44  ;;  %480 = vmatpush1.bf16.msra.mxu0 %v2247_v52 }
  0x35   :  { %1674 = vmatmul.mubr.msk.f32.gmra.mxu0 %vm80_vm0, %v63_v51  ;;  %481 = vmatprep.subr.bf16.mxu0 %v2250_v53 }
  0x36   :  { %205 = vmatprep.mubr.f32.mxu0 %v2052_v1 }
  0x37   :  { %632 = vmatpush1.bf16.msra.mxu1 %v2221_v46 }
  0x38   :  { %633 = vmatprep.subr.bf16.mxu1 %v2224_v47  ;;  %482 = vmatpush1.bf16.msra.mxu0 %v2260_v55 }
  0x39   :  { %1675 = vmatmul.mubr.msk.f32.gmra.mxu0 %vm80_vm0, %v64_v54  ;;  %483 = vmatprep.subr.bf16.mxu0 %v2263_v56 }
  0x3a   :  { %211 = vmatprep.mubr.f32.mxu0 %v2052_v1 }
  0x3b   :  { %634 = vmatpush1.bf16.msra.mxu1 %v2234_v49 }
  0x3c   :  { %635 = vmatprep.subr.bf16.mxu1 %v2237_v50  ;;  %484 = vmatpush1.bf16.msra.mxu0 %v2273_v58 }
  0x3d   :  { %1676 = vmatmul.mubr.msk.f32.gmra.mxu0 %vm80_vm0, %v65_v57  ;;  %485 = vmatprep.subr.bf16.mxu0 %v2276_v59 }
  0x3e   :  { %503 = vmatprep.mubr.bf16.mxu0 %v2053_v2 }
  0x3f   :  { %636 = vmatpush1.bf16.msra.mxu1 %v2247_v52 }
  0x40   :  { %637 = vmatprep.subr.bf16.mxu1 %v2250_v53  ;;  %486 = vmatpush1.bf16.msra.mxu0 %v2289_v63 }
  0x41   :  { %556 = vmatprep.subr.bf16.mxu0 %v2114_v3 }
  0x43   :  { %638 = vmatpush1.bf16.msra.mxu1 %v2260_v55 }
  0x44   :  { %639 = vmatprep.subr.bf16.mxu1 %v2263_v56 }
  0x47   :  { %640 = vmatpush1.bf16.msra.mxu1 %v2273_v58 }
  0x48   :  { %641 = vmatprep.subr.bf16.mxu1 %v2276_v59 }
  0x4b   :  { %642 = vmatpush1.bf16.msra.mxu1 %v2289_v63 }
  0x4c   :  { %868 = vmatprep.subr.bf16.mxu1 %v2114_v3 }
  0xe1   :  { %v171_v20 = vpop.f32.mrf.mxu0 }
  0xe2   :  { %v172_v21 = vadd.f32 %v171_v20, %v2174_v18 }
  0xe3   :  { %v173_v23 = vpop.f32.mrf.mxu0 }
  0xe4   :  { %v174_v25 = vadd.f32 %v173_v23, %v2180_v22 }
  0xee   :  { %v339_v24 = vpop.f32.mrf.mxu1 }
  0xef   :  { %v346_v26 = vadd.f32 %v339_v24, %v172_v21  ;;  %v177_v21 = vpop.f32.mrf.mxu0 }
  0xf0   :  { %v341_v27 = vpop.f32.mrf.mxu1  ;;  %v178_v54 = vadd.f32 %v177_v21, %v2174_v18 }
  0xf1   :  { %v2183_v28 = vadd.f32 %v341_v27, %v174_v25  ;;  %v1685_v32 = vmul.f32 -1.442695, %v346_v26  ;;  %v179_v23 = vpop.f32.mrf.mxu0 }
  0xf2   :  { %v343_v29 = vpop.f32.mrf.mxu1 }
  0xf3   :  { %1788 = vtanh.f32 %v2183_v28  ;;  %v1686_v1 = vmul.f32 -1.442695, %v2183_v28  ;;  %v2319_v24 = vpop.f32.mrf.mxu0 }
  0xf4   :  { %v344_v30 = vpop.f32.mrf.mxu1  ;;  %1790 = vpow2.f32 %v1685_v32 }
  0xf5   :  { %v2321_v25 = vpop.f32.mrf.mxu0 }
  0xf7   :  { %v2323_v26 = vpop.f32.mrf.mxu0 }
  0xf9   :  { %v2325_v27 = vpop.f32.mrf.mxu0 }
  0xfb   :  { %v2327_v28 = vpop.f32.mrf.mxu0 }
  0xfd   :  { %v2329_v29 = vpop.f32.mrf.mxu0 }
  0xff   :  { %v2331_v30 = vpop.f32.mrf.mxu0 }
 0x100   :  { %v1789_v31 = vpop.eup %1788 }
 0x101   :  { %363 = vrot.lane.b32.xlu0 %v1789_v31, %s2054_s2  ;;  %v1791_v33 = vpop.eup %1790  ;;  %v2333_v31 = vpop.f32.mrf.mxu0 }
 0x102   :  { %v354_v34 = vadd.f32 1.0, %v1791_v33 }
 0x103   :  { %v2335_v32 = vpop.f32.mrf.mxu0 }
 0x104   :  { %1792 = vrcp.f32 %v354_v34 }
 0x105   :  { %v2337_v33 = vpop.f32.mrf.mxu0 }
 0x107   :  { %v2339_v34 = vpop.f32.mrf.mxu0 }
 0x111   :  { %v2187_v35 = vpop.eup %1792 }
 0x112   :  { %v361_v60 = vmul.f32 0.0, %v2187_v35 }
 0x173   :  { %v364_v36 = vpop.permute.xlu0 %363 }
 0x174   :  { %v366_v37 = vmul.f32 %v2187_v35, %v364_v36  ;;  %v2341_v35 = vpop.f32.mrf.mxu0  ;;  %v258_v36 = vld [vmem:[%s2750_s5] sm:$0x3] }
 0x176   :  { %368 = vrot.lane.b32.xlu0 %v366_v37, %s2054_s2  ;;  %v2348_v37 = vrot.slane %v258_v36, %v76_v19 }
 0x1e8   :  { %v369_v61 = vpop.permute.xlu0 %368 }
 0x1e9   :  { %v2287_v62 = vadd.f32 %v369_v61, %v361_v60 }
 0x1eb   :  { %1794 = vtanh.f32 %v2287_v62 }
 0x1ec   :  { %1796 = vpow2.f32 %v1686_v1  ;;  %v180_v1 = vadd.f32 %v179_v23, %v2180_v22 }
 0x1f8   :  { %v1795_v0 = vpop.eup %1794 }
 0x1f9   :  { %374 = vrot.lane.b32.xlu1 %v1795_v0, %s2054_s2  ;;  %v1797_v8 = vpop.eup %1796 }
 0x1fa   :  { %v355_v9 = vadd.f32 1.0, %v1797_v8 }
 0x1fc   :  { %1798 = vrcp.f32 %v355_v9 }
 0x209   :  { %v1799_v10 = vpop.eup %1798 }
 0x26b   :  { %v375_v14 = vpop.permute.xlu1 %374 }
 0x26c   :  { %v377_v17 = vmul.f32 %v1799_v10, %v375_v14  ;;  %v2357_v14 = vrot.slane %v258_v36, %v72_v16 }
 0x26e   :  { %v1704_v20 = vpack.c.bf16 %v377_v17, %v377_v17 }
 0x270   :  { %1705 = vmatmul.mubr.msk.bf16.vlgmr.msra.gmra.mxu0 %vm1703_vm2, %v1704_v20 }
 0x271   :  { %557 = vmatpush1.bf16.msra.mxu0 %v2119_v4  ;;  %580 = vmatprep.mubr.bf16.mxu0 %v2053_v2 }
 0x272   :  { %558 = vmatprep.subr.bf16.mxu0 %v2125_v5 }
 0x275   :  { %559 = vmatpush1.bf16.msra.mxu0 %v2131_v6 }
 0x276   :  { %560 = vmatprep.subr.bf16.mxu0 %v2136_v7 }
 0x279   :  { %561 = vmatpush1.bf16.msra.mxu0 %v2145_v11 }
 0x27a   :  { %562 = vmatprep.subr.bf16.mxu0 %v2150_v12 }
 0x27d   :  { %563 = vmatpush1.bf16.msra.mxu0 %v2159_v13 }
 0x27e   :  { %712 = vmatprep.subr.bf16.mxu0 %v2114_v3 }
 0x280   :  { %1708 = vmatmul.mubr.msk.bf16.vlgmr.msra.gmra.mxu0 %vm301_vm1, %v1704_v20 }
 0x281   :  { %713 = vmatpush1.bf16.msra.mxu0 %v2119_v4  ;;  %736 = vmatprep.mubr.bf16.mxu0 %v2053_v2 }
 0x282   :  { %714 = vmatprep.subr.bf16.mxu0 %v2125_v5 }
 0x285   :  { %715 = vmatpush1.bf16.msra.mxu0 %v2131_v6 }
 0x286   :  { %716 = vmatprep.subr.bf16.mxu0 %v2136_v7 }
 0x289   :  { %717 = vmatpush1.bf16.msra.mxu0 %v2145_v11 }
 0x28a   :  { %718 = vmatprep.subr.bf16.mxu0 %v2150_v12 }
 0x28d   :  { %719 = vmatpush1.bf16.msra.mxu0 %v2159_v13 }
 0x28e   :  { %783 = vmatprep.subr.bf16.mxu0 %v2191_v38 }
 0x330   :  { %v505_v40 = vpop.f32.mrf.mxu0 }
 0x331   :  { %v506_v17 = vadd.f32 %v505_v40, %v2357_v14 }
 0x332   :  { %v507_v42 = vpop.f32.mrf.mxu0 }
 0x333   :  { %v508_v45 = vadd.f32 %v507_v42, %v2348_v37  ;;  %v1706_v20 = vmul.f32 -1.442695, %v506_v17 }
 0x334   :  { %v509_v48 = vpop.f32.mrf.mxu0 }
 0x335   :  { %1800 = vtanh.f32 %v508_v45 }
 0x336   :  { %v510_v51 = vpop.f32.mrf.mxu0 }
 0x340   :  { %v582_v57 = vpop.f32.mrf.mxu0 }
 0x341   :  { %v589_v60 = vadd.f32 %v582_v57, %v178_v54 }
 0x342   :  { %v584_v61 = vpop.f32.mrf.mxu0  ;;  %v1801_v0 = vpop.eup %1800 }
 0x343   :  { %527 = vrot.lane.b32.xlu1 %v1801_v0, %s2054_s2  ;;  %v590_v19 = vadd.f32 %v584_v61, %v180_v1  ;;  %v1709_v42 = vmul.f32 -1.442695, %v589_v60 }
 0x344   :  { %v586_v8 = vpop.f32.mrf.mxu0 }
 0x345   :  { %1802 = vtanh.f32 %v590_v19 }
 0x346   :  { %v587_v9 = vpop.f32.mrf.mxu0  ;;  %1804 = vpow2.f32 %v1706_v20  ;;  %v1707_v20 = vmul.f32 -1.442695, %v508_v45 }
 0x347   :  { %1806 = vpow2.f32 %v1709_v42  ;;  %v1710_v42 = vmul.f32 -1.442695, %v590_v19 }
 0x352   :  { %v1803_v10 = vpop.eup %1802 }
 0x353   :  { %606 = vrot.lane.b32.xlu0 %v1803_v10, %s2054_s2  ;;  %v1805_v21 = vpop.eup %1804 }
 0x354   :  { %v518_v23 = vadd.f32 1.0, %v1805_v21  ;;  %v1807_v48 = vpop.eup %1806 }
 0x355   :  { %v597_v61 = vadd.f32 1.0, %v1807_v48 }
 0x356   :  { %1808 = vrcp.f32 %v518_v23 }
 0x357   :  { %1810 = vrcp.f32 %v597_v61 }
 0x363   :  { %v1809_v51 = vpop.eup %1808 }
 0x364   :  { %v1811_v15 = vpop.eup %1810  ;;  %v525_v40 = vmul.f32 0.0, %v1809_v51 }
 0x365   :  { %v604_v8 = vmul.f32 %v1811_v15, %v2287_v62 }
 0x3b5   :  { %v528_v54 = vpop.permute.xlu1 %527 }
 0x3b6   :  { %v530_v57 = vmul.f32 %v1809_v51, %v528_v54 }
 0x3b8   :  { %532 = vrot.lane.b32.xlu1 %v530_v57, %s2054_s2 }
 0x3c5   :  { %v607_v16 = vpop.permute.xlu0 %606 }
 0x3c6   :  { %v609_v36 = vmul.f32 %v1811_v15, %v607_v16 }
 0x3c8   :  { %611 = vrot.lane.b32.xlu0 %v609_v36, %s2054_s2 }
 0x42a   :  { %v533_v0 = vpop.permute.xlu1 %532 }
 0x42b   :  { %v2362_v1 = vadd.f32 %v533_v0, %v525_v40  ;;  %v184_v0 = vadd.f32 %v2319_v24, %v2174_v18 }
 0x42d   :  { %1812 = vtanh.f32 %v2362_v1 }
 0x43a   :  { %v1813_v60 = vpop.eup %1812  ;;  %v612_v9 = vpop.permute.xlu0 %611 }
 0x43b   :  { %538 = vrot.lane.b32.xlu1 %v1813_v60, %s2054_s2  ;;  %v2367_v10 = vadd.f32 %v612_v9, %v604_v8  ;;  %v186_v8 = vadd.f32 %v2321_v25, %v2180_v22 }
 0x43d   :  { %1814 = vtanh.f32 %v2367_v10 }
 0x43e   :  { %1816 = vpow2.f32 %v1707_v20 }
 0x43f   :  { %1818 = vpow2.f32 %v1710_v42 }
 0x44a   :  { %v1815_v17 = vpop.eup %1814 }
 0x44b   :  { %617 = vrot.lane.b32.xlu0 %v1815_v17, %s2054_s2  ;;  %v1817_v21 = vpop.eup %1816 }
 0x44c   :  { %v519_v23 = vadd.f32 1.0, %v1817_v21  ;;  %v1819_v48 = vpop.eup %1818 }
 0x44d   :  { %v598_v62 = vadd.f32 1.0, %v1819_v48 }
 0x44e   :  { %1820 = vrcp.f32 %v519_v23 }
 0x44f   :  { %1822 = vrcp.f32 %v598_v62 }
 0x45b   :  { %v1821_v51 = vpop.eup %1820 }
 0x45c   :  { %v1823_v61 = vpop.eup %1822 }
 0x4ad   :  { %v539_v54 = vpop.permute.xlu1 %538 }
 0x4ae   :  { %v541_v57 = vmul.f32 %v1821_v51, %v539_v54 }
 0x4b0   :  { %622 = vrot.lane.b32.xlu1 %v541_v57, %s2054_s2 }
 0x4bd   :  { %v618_v15 = vpop.permute.xlu0 %617 }
 0x4be   :  { %v620_v16 = vmul.f32 %v1823_v61, %v618_v15 }
 0x4c0   :  { %v700_v36 = vpack.c.bf16 %v620_v16, %v620_v16 }
 0x4c2   :  { %1713 = vmatmul.mubr.msk.bf16.vlgmr.msra.gmra.mxu0 %vm301_vm1, %v700_v36 }
 0x4c3   :  { %784 = vmatpush1.bf16.msra.mxu0 %v2193_v39  ;;  %815 = vmatprep.mubr.bf16.mxu0 %v2053_v2 }
 0x4c4   :  { %785 = vmatprep.subr.bf16.mxu0 %v2199_v41 }
 0x4c7   :  { %786 = vmatpush1.bf16.msra.mxu0 %v2207_v43 }
 0x4c8   :  { %787 = vmatprep.subr.bf16.mxu0 %v2211_v44 }
 0x4cb   :  { %788 = vmatpush1.bf16.msra.mxu0 %v2221_v46 }
 0x4cc   :  { %789 = vmatprep.subr.bf16.mxu0 %v2224_v47 }
 0x4cf   :  { %790 = vmatpush1.bf16.msra.mxu0 %v2234_v49 }
 0x4d0   :  { %791 = vmatprep.subr.bf16.mxu0 %v2237_v50 }
 0x4d3   :  { %792 = vmatpush1.bf16.msra.mxu0 %v2247_v52 }
 0x4d4   :  { %793 = vmatprep.subr.bf16.mxu0 %v2250_v53 }
 0x4d7   :  { %794 = vmatpush1.bf16.msra.mxu0 %v2260_v55 }
 0x4d8   :  { %795 = vmatprep.subr.bf16.mxu0 %v2263_v56 }
 0x4db   :  { %796 = vmatpush1.bf16.msra.mxu0 %v2273_v58 }
 0x4dc   :  { %797 = vmatprep.subr.bf16.mxu0 %v2276_v59 }
 0x4df   :  { %798 = vmatpush1.bf16.msra.mxu0 %v2289_v63 }
 0x4e0   :  { %1024 = vmatprep.subr.bf16.mxu0 %v2114_v3 }
 0x522   :  { %v623_v45 = vpop.permute.xlu1 %622 }
 0x523   :  { %v625_v19 = vsel %vm301_vm1, %v620_v16, %v623_v45 }
 0x524   :  { %v626_v40 = vpack.c.bf16 %v625_v19, %v625_v19 }
 0x526   :  { %660 = vmatmul.mubr.bf16.vlgmr.msra.gmra.mxu1 %v626_v40 }
 0x527   :  { %869 = vmatpush1.bf16.msra.mxu1 %v2119_v4  ;;  %892 = vmatprep.mubr.bf16.mxu1 %v2053_v2 }
 0x528   :  { %870 = vmatprep.subr.bf16.mxu1 %v2125_v5 }
 0x52b   :  { %871 = vmatpush1.bf16.msra.mxu1 %v2131_v6 }
 0x52c   :  { %872 = vmatprep.subr.bf16.mxu1 %v2136_v7 }
 0x52f   :  { %873 = vmatpush1.bf16.msra.mxu1 %v2145_v11 }
 0x530   :  { %874 = vmatprep.subr.bf16.mxu1 %v2150_v12 }
 0x533   :  { %875 = vmatpush1.bf16.msra.mxu1 %v2159_v13 }
 0x534   :  { %939 = vmatprep.subr.bf16.mxu1 %v2191_v38 }
 0x582   :  { %v738_v60 = vpop.f32.mrf.mxu0 }
 0x583   :  { %v745_v9 = vadd.f32 %v738_v60, %v184_v0 }
 0x584   :  { %v740_v17 = vpop.f32.mrf.mxu0 }
 0x585   :  { %v746_v20 = vadd.f32 %v740_v17, %v186_v8  ;;  %v1714_v48 = vmul.f32 -1.442695, %v745_v9 }
 0x586   :  { %v742_v21 = vpop.f32.mrf.mxu0 }
 0x587   :  { %1824 = vtanh.f32 %v746_v20 }
 0x588   :  { %v743_v42 = vpop.f32.mrf.mxu0  ;;  %1826 = vpow2.f32 %v1714_v48 }
 0x594   :  { %v1825_v23 = vpop.eup %1824 }
 0x595   :  { %762 = vrot.lane.b32.xlu1 %v1825_v23, %s2054_s2  ;;  %v1827_v61 = vpop.eup %1826 }
 0x596   :  { %v753_v15 = vadd.f32 1.0, %v1827_v61 }
 0x5e6   :  { %v661_v51 = vpop.f32.mrf.mxu1 }
 0x5e7   :  { %v662_v19 = vadd.f32 %v661_v51, %v2357_v14  ;;  %v1715_v51 = vmul.f32 -1.442695, %v746_v20 }
 0x5e8   :  { %v663_v54 = vpop.f32.mrf.mxu1 }
 0x5e9   :  { %v664_v57 = vadd.f32 %v663_v54, %v2348_v37  ;;  %v1711_v40 = vmul.f32 -1.442695, %v662_v19 }
 0x5ea   :  { %v665_v24 = vpop.f32.mrf.mxu1 }
 0x5eb   :  { %1828 = vtanh.f32 %v664_v57 }
 0x5ec   :  { %v666_v62 = vpop.f32.mrf.mxu1  ;;  %1830 = vrcp.f32 %v753_v15 }
 0x5ed   :  { %1832 = vpow2.f32 %v1711_v40 }
 0x5f8   :  { %v1829_v25 = vpop.eup %1828 }
 0x5f9   :  { %683 = vrot.lane.b32.xlu0 %v1829_v25, %s2054_s2  ;;  %v1831_v16 = vpop.eup %1830 }
 0x5fa   :  { %v1833_v0 = vpop.eup %1832  ;;  %v760_v21 = vmul.f32 %v1831_v16, %v2367_v10 }
 0x5fb   :  { %v674_v60 = vadd.f32 1.0, %v1833_v0 }
 0x5fd   :  { %1834 = vrcp.f32 %v674_v60 }
 0x607   :  { %v763_v36 = vpop.permute.xlu1 %762 }
 0x608   :  { %v765_v45 = vmul.f32 %v1831_v16, %v763_v36 }
 0x60a   :  { %767 = vrot.lane.b32.xlu1 %v765_v45, %s2054_s2  ;;  %v1835_v8 = vpop.eup %1834 }
 0x60b   :  { %v681_v54 = vmul.f32 %v1835_v8, %v2362_v1  ;;  %v1712_v1 = vmul.f32 -1.442695, %v664_v57 }
 0x66b   :  { %v684_v9 = vpop.permute.xlu0 %683 }
 0x66c   :  { %v686_v17 = vmul.f32 %v1835_v8, %v684_v9  ;;  %v190_v8 = vadd.f32 %v2323_v26, %v2174_v18 }
 0x66e   :  { %688 = vrot.lane.b32.xlu0 %v686_v17, %s2054_s2  ;;  %v192_v17 = vadd.f32 %v2325_v27, %v2180_v22 }
 0x67c   :  { %v768_v42 = vpop.permute.xlu1 %767 }
 0x67d   :  { %v2411_v23 = vadd.f32 %v768_v42, %v760_v21 }
 0x67f   :  { %1836 = vtanh.f32 %v2411_v23 }
 0x680   :  { %1838 = vpow2.f32 %v1715_v51 }
 0x68c   :  { %v1837_v48 = vpop.eup %1836 }
 0x68d   :  { %773 = vrot.lane.b32.xlu1 %v1837_v48, %s2054_s2  ;;  %v1839_v61 = vpop.eup %1838 }
 0x68e   :  { %v754_v10 = vadd.f32 1.0, %v1839_v61 }
 0x6e0   :  { %v689_v24 = vpop.permute.xlu0 %688 }
 0x6e1   :  { %v2416_v62 = vadd.f32 %v689_v24, %v681_v54 }
 0x6e3   :  { %1840 = vtanh.f32 %v2416_v62 }
 0x6e4   :  { %1842 = vrcp.f32 %v754_v10 }
 0x6e5   :  { %1844 = vpow2.f32 %v1712_v1 }
 0x6f0   :  { %v1841_v25 = vpop.eup %1840 }
 0x6f1   :  { %694 = vrot.lane.b32.xlu0 %v1841_v25, %s2054_s2  ;;  %v1843_v15 = vpop.eup %1842 }
 0x6f2   :  { %v1845_v20 = vpop.eup %1844 }
 0x6f3   :  { %v675_v19 = vadd.f32 1.0, %v1845_v20 }
 0x6f5   :  { %1846 = vrcp.f32 %v675_v19 }
 0x6ff   :  { %v774_v16 = vpop.permute.xlu1 %773 }
 0x700   :  { %v776_v36 = vmul.f32 %v1843_v15, %v774_v16 }
 0x702   :  { %v856_v45 = vpack.c.bf16 %v776_v36, %v776_v36  ;;  %v1847_v40 = vpop.eup %1846 }
 0x704   :  { %1718 = vmatmul.mubr.msk.bf16.vlgmr.msra.gmra.mxu1 %vm301_vm1, %v856_v45 }
 0x705   :  { %940 = vmatpush1.bf16.msra.mxu1 %v2193_v39  ;;  %971 = vmatprep.mubr.bf16.mxu1 %v2053_v2 }
 0x706   :  { %941 = vmatprep.subr.bf16.mxu1 %v2199_v41 }
 0x709   :  { %942 = vmatpush1.bf16.msra.mxu1 %v2207_v43 }
 0x70a   :  { %943 = vmatprep.subr.bf16.mxu1 %v2211_v44 }
 0x70d   :  { %944 = vmatpush1.bf16.msra.mxu1 %v2221_v46 }
 0x70e   :  { %945 = vmatprep.subr.bf16.mxu1 %v2224_v47 }
 0x711   :  { %946 = vmatpush1.bf16.msra.mxu1 %v2234_v49 }
 0x712   :  { %947 = vmatprep.subr.bf16.mxu1 %v2237_v50 }
 0x715   :  { %948 = vmatpush1.bf16.msra.mxu1 %v2247_v52 }
 0x716   :  { %949 = vmatprep.subr.bf16.mxu1 %v2250_v53 }
 0x719   :  { %950 = vmatpush1.bf16.msra.mxu1 %v2260_v55 }
 0x71a   :  { %951 = vmatprep.subr.bf16.mxu1 %v2263_v56 }
 0x71d   :  { %952 = vmatpush1.bf16.msra.mxu1 %v2273_v58 }
 0x71e   :  { %953 = vmatprep.subr.bf16.mxu1 %v2276_v59 }
 0x721   :  { %954 = vmatpush1.bf16.msra.mxu1 %v2289_v63 }
 0x722   :  { %1180 = vmatprep.subr.bf16.mxu1 %v2114_v3 }
 0x763   :  { %v695_v0 = vpop.permute.xlu0 %694 }
 0x764   :  { %v697_v60 = vmul.f32 %v1847_v40, %v695_v0 }
 0x766   :  { %778 = vrot.lane.b32.xlu0 %v697_v60, %s2054_s2 }
 0x7c4   :  { %v894_v9 = vpop.f32.mrf.mxu1 }
 0x7c5   :  { %v901_v21 = vadd.f32 %v894_v9, %v190_v8 }
 0x7c6   :  { %v896_v42 = vpop.f32.mrf.mxu1 }
 0x7c7   :  { %v902_v48 = vadd.f32 %v896_v42, %v192_v17  ;;  %v1719_v26 = vmul.f32 -1.442695, %v901_v21 }
 0x7c8   :  { %v898_v57 = vpop.f32.mrf.mxu1 }
 0x7c9   :  { %1848 = vtanh.f32 %v902_v48 }
 0x7ca   :  { %v899_v51 = vpop.f32.mrf.mxu1  ;;  %1850 = vpow2.f32 %v1719_v26 }
 0x7d6   :  { %v1849_v61 = vpop.eup %1848 }
 0x7d7   :  { %918 = vrot.lane.b32.xlu0 %v1849_v61, %s2054_s2  ;;  %v1851_v27 = vpop.eup %1850 }
 0x7d8   :  { %v779_v54 = vpop.permute.xlu0 %778  ;;  %v909_v10 = vadd.f32 1.0, %v1851_v27 }
 0x7d9   :  { %v781_v24 = vsel %vm301_vm1, %v776_v36, %v779_v54  ;;  %v1720_v54 = vmul.f32 -1.442695, %v902_v48 }
 0x7da   :  { %v782_v25 = vpack.c.bf16 %v781_v24, %v781_v24  ;;  %1852 = vrcp.f32 %v909_v10 }
 0x7dc   :  { %816 = vmatmul.mubr.bf16.vlgmr.msra.gmra.mxu0 %v782_v25 }
 0x7dd   :  { %1025 = vmatpush1.bf16.msra.mxu0 %v2119_v4  ;;  %1048 = vmatprep.mubr.bf16.mxu0 %v2053_v2 }
 0x7de   :  { %1026 = vmatprep.subr.bf16.mxu0 %v2125_v5 }
 0x7e1   :  { %1027 = vmatpush1.bf16.msra.mxu0 %v2131_v6 }
 0x7e2   :  { %1028 = vmatprep.subr.bf16.mxu0 %v2136_v7 }
 0x7e5   :  { %1029 = vmatpush1.bf16.msra.mxu0 %v2145_v11 }
 0x7e6   :  { %1030 = vmatprep.subr.bf16.mxu0 %v2150_v12 }
 0x7e7   :  { %v1853_v15 = vpop.eup %1852 }
 0x7e8   :  { %v916_v60 = vmul.f32 %v1853_v15, %v2411_v23 }
 0x7e9   :  { %1031 = vmatpush1.bf16.msra.mxu0 %v2159_v13 }
 0x7ea   :  { %1095 = vmatprep.subr.bf16.mxu0 %v2191_v38 }
 0x849   :  { %v919_v16 = vpop.permute.xlu0 %918 }
 0x84a   :  { %v921_v36 = vmul.f32 %v1853_v15, %v919_v16 }
 0x84c   :  { %923 = vrot.lane.b32.xlu0 %v921_v36, %s2054_s2 }
 0x89c   :  { %v817_v45 = vpop.f32.mrf.mxu0 }
 0x89d   :  { %v818_v21 = vadd.f32 %v817_v45, %v2357_v14 }
 0x89e   :  { %v819_v1 = vpop.f32.mrf.mxu0 }
 0x89f   :  { %v820_v20 = vadd.f32 %v819_v1, %v2348_v37  ;;  %v1716_v42 = vmul.f32 -1.442695, %v818_v21 }
 0x8a0   :  { %v821_v19 = vpop.f32.mrf.mxu0 }
 0x8a1   :  { %1854 = vtanh.f32 %v820_v20  ;;  %v1717_v19 = vmul.f32 -1.442695, %v820_v20 }
 0x8a2   :  { %v822_v40 = vpop.f32.mrf.mxu0 }
 0x8ae   :  { %v1855_v0 = vpop.eup %1854 }
 0x8af   :  { %839 = vrot.lane.b32.xlu1 %v1855_v0, %s2054_s2  ;;  %v196_v0 = vadd.f32 %v2327_v28, %v2174_v18 }
 0x8be   :  { %v924_v8 = vpop.permute.xlu0 %923 }
 0x8bf   :  { %v2458_v9 = vadd.f32 %v924_v8, %v916_v60 }
 0x8c1   :  { %1856 = vtanh.f32 %v2458_v9 }
 0x8c2   :  { %1858 = vpow2.f32 %v1716_v42 }
 0x8ce   :  { %v1857_v17 = vpop.eup %1856 }
 0x8cf   :  { %929 = vrot.lane.b32.xlu0 %v1857_v17, %s2054_s2  ;;  %v1859_v57 = vpop.eup %1858 }
 0x8d0   :  { %v830_v51 = vadd.f32 1.0, %v1859_v57 }
 0x8d2   :  { %1860 = vrcp.f32 %v830_v51 }
 0x8d3   :  { %1862 = vpow2.f32 %v1720_v54 }
 0x8df   :  { %v1861_v24 = vpop.eup %1860 }
 0x8e0   :  { %v1863_v23 = vpop.eup %1862  ;;  %v837_v48 = vmul.f32 %v1861_v24, %v2416_v62  ;;  %v198_v62 = vadd.f32 %v2329_v29, %v2180_v22 }
 0x8e1   :  { %v910_v26 = vadd.f32 1.0, %v1863_v23 }
 0x8e3   :  { %1864 = vrcp.f32 %v910_v26 }
 0x8f0   :  { %v1865_v27 = vpop.eup %1864 }
 0x921   :  { %v840_v61 = vpop.permute.xlu1 %839 }
 0x922   :  { %v842_v25 = vmul.f32 %v1861_v24, %v840_v61 }
 0x924   :  { %844 = vrot.lane.b32.xlu1 %v842_v25, %s2054_s2 }
 0x941   :  { %v930_v10 = vpop.permute.xlu0 %929 }
 0x942   :  { %v932_v15 = vmul.f32 %v1865_v27, %v930_v10 }
 0x944   :  { %v1012_v16 = vpack.c.bf16 %v932_v15, %v932_v15 }
 0x946   :  { %1723 = vmatmul.mubr.msk.bf16.vlgmr.msra.gmra.mxu0 %vm301_vm1, %v1012_v16 }
 0x947   :  { %1096 = vmatpush1.bf16.msra.mxu0 %v2193_v39  ;;  %1127 = vmatprep.mubr.bf16.mxu0 %v2053_v2 }
 0x948   :  { %1097 = vmatprep.subr.bf16.mxu0 %v2199_v41 }
 0x94b   :  { %1098 = vmatpush1.bf16.msra.mxu0 %v2207_v43 }
 0x94c   :  { %1099 = vmatprep.subr.bf16.mxu0 %v2211_v44 }
 0x94f   :  { %1100 = vmatpush1.bf16.msra.mxu0 %v2221_v46 }
 0x950   :  { %1101 = vmatprep.subr.bf16.mxu0 %v2224_v47 }
 0x953   :  { %1102 = vmatpush1.bf16.msra.mxu0 %v2234_v49 }
 0x954   :  { %1103 = vmatprep.subr.bf16.mxu0 %v2237_v50 }
 0x957   :  { %1104 = vmatpush1.bf16.msra.mxu0 %v2247_v52 }
 0x958   :  { %1105 = vmatprep.subr.bf16.mxu0 %v2250_v53 }
 0x95b   :  { %1106 = vmatpush1.bf16.msra.mxu0 %v2260_v55 }
 0x95c   :  { %1107 = vmatprep.subr.bf16.mxu0 %v2263_v56 }
 0x95f   :  { %1108 = vmatpush1.bf16.msra.mxu0 %v2273_v58 }
 0x960   :  { %1109 = vmatprep.subr.bf16.mxu0 %v2276_v59 }
 0x963   :  { %1110 = vmatpush1.bf16.msra.mxu0 %v2289_v63 }
 0x964   :  { %1336 = vmatprep.subr.bf16.mxu0 %v2114_v3 }
 0x996   :  { %v845_v36 = vpop.permute.xlu1 %844 }
 0x997   :  { %v2483_v45 = vadd.f32 %v845_v36, %v837_v48 }
 0x999   :  { %1866 = vtanh.f32 %v2483_v45 }
 0x99a   :  { %1868 = vpow2.f32 %v1717_v19 }
 0x9a6   :  { %v1867_v1 = vpop.eup %1866 }
 0x9a7   :  { %850 = vrot.lane.b32.xlu1 %v1867_v1, %s2054_s2  ;;  %v1869_v40 = vpop.eup %1868 }
 0x9a8   :  { %v831_v60 = vadd.f32 1.0, %v1869_v40 }
 0x9aa   :  { %1870 = vrcp.f32 %v831_v60 }
 0x9b7   :  { %v1871_v51 = vpop.eup %1870 }
 0xa06   :  { %v1050_v8 = vpop.f32.mrf.mxu0 }
 0xa07   :  { %v1057_v17 = vadd.f32 %v1050_v8, %v196_v0 }
 0xa08   :  { %v1052_v3 = vpop.f32.mrf.mxu0 }
 0xa09   :  { %v1058_v42 = vadd.f32 %v1052_v3, %v198_v62  ;;  %v1724_v28 = vmul.f32 -1.442695, %v1057_v17 }
 0xa0a   :  { %v1054_v21 = vpop.f32.mrf.mxu0 }
 0xa0b   :  { %1872 = vtanh.f32 %v1058_v42  ;;  %v1725_v1 = vmul.f32 -1.442695, %v1058_v42 }
 0xa0c   :  { %v1055_v57 = vpop.f32.mrf.mxu0  ;;  %1874 = vpow2.f32 %v1724_v28 }
 0xa18   :  { %v1873_v24 = vpop.eup %1872 }
 0xa19   :  { %v851_v54 = vpop.permute.xlu1 %850  ;;  %v1875_v61 = vpop.eup %1874 }
 0xa1a   :  { %v853_v20 = vmul.f32 %v1871_v51, %v851_v54  ;;  %v1065_v25 = vadd.f32 1.0, %v1875_v61 }
 0xa1c   :  { %934 = vrot.lane.b32.xlu1 %v853_v20, %s2054_s2  ;;  %1876 = vrcp.f32 %v1065_v25 }
 0xa20   :  { %1074 = vrot.lane.b32.xlu1 %v1873_v24, %s2054_s2 }
 0xa29   :  { %v1877_v27 = vpop.eup %1876 }
 0xa8e   :  { %v935_v23 = vpop.permute.xlu1 %934 }
 0xa8f   :  { %v937_v29 = vsel %vm301_vm1, %v932_v15, %v935_v23 }
 0xa90   :  { %v938_v26 = vpack.c.bf16 %v937_v29, %v937_v29 }
 0xa92   :  { %972 = vmatmul.mubr.bf16.vlgmr.msra.gmra.mxu1 %v938_v26  ;;  %v1075_v10 = vpop.permute.xlu1 %1074 }
 0xa93   :  { %v1077_v16 = vmul.f32 %v1877_v27, %v1075_v10  ;;  %1181 = vmatpush1.bf16.msra.mxu1 %v2119_v4  ;;  %1204 = vmatprep.mubr.bf16.mxu1 %v2053_v2  ;;  %v1072_v4 = vmul.f32 %v1877_v27, %v2458_v9 }
 0xa94   :  { %1182 = vmatprep.subr.bf16.mxu1 %v2125_v5 }
 0xa95   :  { %1079 = vrot.lane.b32.xlu1 %v1077_v16, %s2054_s2  ;;  %v2553_v16 = vld [vmem:[%s2748_s3 + $0x30] ss:$8 sps:$4 sm:$0xff]  }
 0xa97   :  { %1183 = vmatpush1.bf16.msra.mxu1 %v2131_v6 }
 0xa98   :  { %1184 = vmatprep.subr.bf16.mxu1 %v2136_v7 }
 0xa9b   :  { %1185 = vmatpush1.bf16.msra.mxu1 %v2145_v11 }
 0xa9c   :  { %1186 = vmatprep.subr.bf16.mxu1 %v2150_v12 }
 0xa9f   :  { %1187 = vmatpush1.bf16.msra.mxu1 %v2159_v13 }
 0xaa0   :  { %1251 = vmatprep.subr.bf16.mxu1 %v2191_v38 }
 0xb07   :  { %v1080_v15 = vpop.permute.xlu1 %1079 }
 0xb08   :  { %v2505_v48 = vadd.f32 %v1080_v15, %v1072_v4  ;;  %v2560_v4 = vld [vmem:[%s2748_s3 + $0x24] ss:$8 sps:$4 sm:$0xff]   ;;  %v2567_v15 = vld [vmem:[%s2748_s3 + $0x20] ss:$8 sps:$4 sm:$0xff]  }
 0xb0a   :  { %1878 = vtanh.f32 %v2505_v48 }
 0xb17   :  { %v1879_v5 = vpop.eup %1878 }
 0xb18   :  { %1085 = vrot.lane.b32.xlu1 %v1879_v5, %s2054_s2  ;;  %v2573_v5 = vld [vmem:[%s2748_s3 + $0x14] ss:$8 sps:$4 sm:$0xff]  }
 0xb52   :  { %v973_v6 = vpop.f32.mrf.mxu1 }
 0xb54   :  { %v975_v7 = vpop.f32.mrf.mxu1 }
 0xb55   :  { %v976_v11 = vadd.f32 %v975_v7, %v2348_v37  ;;  %v2585_v7 = vld [vmem:[%s2748_s3 + $0x4] ss:$8 sps:$4 sm:$0xff]  }
 0xb56   :  { %v977_v36 = vpop.f32.mrf.mxu1 }
 0xb57   :  { %1880 = vtanh.f32 %v976_v11  ;;  %v2594_v36 = vld [vmem:[#allocation6 + $0x74] ss:$8 sps:$4 sm:$0xff]  }
 0xb58   :  { %v978_v12 = vpop.f32.mrf.mxu1  ;;  %1882 = vpow2.f32 %v1725_v1 }
 0xb64   :  { %v1881_v13 = vpop.eup %1880 }
 0xb65   :  { %995 = vrot.lane.b32.xlu0 %v1881_v13, %s2054_s2  ;;  %v1883_v38 = vpop.eup %1882 }
 0xb66   :  { %v1066_v9 = vadd.f32 1.0, %v1883_v38 }
 0xb68   :  { %1884 = vrcp.f32 %v1066_v9 }
 0xb75   :  { %v1885_v19 = vpop.eup %1884 }
 0xb8a   :  { %v1086_v40 = vpop.permute.xlu1 %1085 }
 0xb8b   :  { %v2511_v0 = vmul.f32 %v1885_v19, %v1086_v40 }
 0xb8d   :  { %v1168_v60 = vpack.c.bf16 %v2511_v0, %v2511_v0 }
 0xb8f   :  { %1728 = vmatmul.mubr.msk.bf16.vlgmr.msra.gmra.mxu1 %vm301_vm1, %v1168_v60 }
 0xb90   :  { %1252 = vmatpush1.bf16.msra.mxu1 %v2193_v39  ;;  %1283 = vmatprep.mubr.bf16.mxu1 %v2053_v2  ;;  %v1980_v39 = vld [vmem:[%s2748_s3 + $0x34] ss:$8 sps:$4 sm:$0xff]  }
 0xb91   :  { %1253 = vmatprep.subr.bf16.mxu1 %v2199_v41  ;;  %v974_v41 = vadd.f32 %v973_v6, %v2357_v14  ;;  %v2579_v6 = vld [vmem:[%s2748_s3 + $0x10] ss:$8 sps:$4 sm:$0xff]  }
 0xb94   :  { %1254 = vmatpush1.bf16.msra.mxu1 %v2207_v43  ;;  %v1721_v43 = vmul.f32 -1.442695, %v974_v41 }
 0xb95   :  { %1255 = vmatprep.subr.bf16.mxu1 %v2211_v44 }
 0xb96   :  { %1886 = vpow2.f32 %v1721_v43 }
 0xb98   :  { %1256 = vmatpush1.bf16.msra.mxu1 %v2221_v46 }
 0xb99   :  { %1257 = vmatprep.subr.bf16.mxu1 %v2224_v47 }
 0xb9c   :  { %1258 = vmatpush1.bf16.msra.mxu1 %v2234_v49 }
 0xb9d   :  { %1259 = vmatprep.subr.bf16.mxu1 %v2237_v50 }
 0xba0   :  { %1260 = vmatpush1.bf16.msra.mxu1 %v2247_v52 }
 0xba1   :  { %1261 = vmatprep.subr.bf16.mxu1 %v2250_v53 }
 0xba3   :  { %v1887_v44 = vpop.eup %1886 }
 0xba4   :  { %1262 = vmatpush1.bf16.msra.mxu1 %v2260_v55  ;;  %v986_v46 = vadd.f32 1.0, %v1887_v44  ;;  %v202_v55 = vadd.f32 %v2331_v30, %v2174_v18 }
 0xba5   :  { %1263 = vmatprep.subr.bf16.mxu1 %v2263_v56 }
 0xba6   :  { %1888 = vrcp.f32 %v986_v46 }
 0xba8   :  { %1264 = vmatpush1.bf16.msra.mxu1 %v2273_v58 }
 0xba9   :  { %1265 = vmatprep.subr.bf16.mxu1 %v2276_v59  ;;  %v204_v59 = vadd.f32 %v2333_v31, %v2180_v22 }
 0xbac   :  { %1266 = vmatpush1.bf16.msra.mxu1 %v2289_v63 }
 0xbad   :  { %1492 = vmatprep.subr.bf16.mxu1 %v1980_v39 }
 0xbb3   :  { %v1889_v47 = vpop.eup %1888 }
 0xbb4   :  { %v993_v52 = vmul.f32 %v1889_v47, %v2483_v45  ;;  %v1722_v45 = vmul.f32 -1.442695, %v976_v11  ;;  %v2591_v11 = vld [vmem:[%s2748_s3] ss:$8 sps:$4 sm:$0xff]  }
 0xbd7   :  { %v996_v49 = vpop.permute.xlu0 %995 }
 0xbd8   :  { %v998_v50 = vmul.f32 %v1889_v47, %v996_v49 }
 0xbda   :  { %1000 = vrot.lane.b32.xlu0 %v998_v50, %s2054_s2  ;;  %v2612_v50 = vld [vmem:[#allocation6 + $0x70] ss:$8 sps:$4 sm:$0xff]  }
 0xc4c   :  { %v1001_v53 = vpop.permute.xlu0 %1000 }
 0xc4d   :  { %v2540_v56 = vadd.f32 %v1001_v53, %v993_v52  ;;  %v2616_v52 = vld [vmem:[#allocation6 + $0x64] ss:$8 sps:$4 sm:$0xff]   ;;  %v2619_v53 = vld [vmem:[#allocation6 + $0x60] ss:$8 sps:$4 sm:$0xff]  }
 0xc4f   :  { %v1206_v58 = vpop.f32.mrf.mxu1  ;;  %1890 = vtanh.f32 %v2540_v56 }
 0xc50   :  { %v1213_v8 = vadd.f32 %v1206_v58, %v202_v55  ;;  %1892 = vpow2.f32 %v1722_v45  ;;  %v2622_v55 = vld [vmem:[#allocation6 + $0x54] ss:$8 sps:$4 sm:$0xff]   ;;  %v2625_v58 = vld [vmem:[#allocation6 + $0x50] ss:$8 sps:$4 sm:$0xff]  }
 0xc51   :  { %v1208_v17 = vpop.f32.mrf.mxu1  ;;  %v2649_v45 = vld [vmem:[#allocation6 + $0x10] ss:$8 sps:$4 sm:$0xff]  }
 0xc52   :  { %v1214_v3 = vadd.f32 %v1208_v17, %v204_v59  ;;  %v1729_v24 = vmul.f32 -1.442695, %v1213_v8  ;;  %v2628_v59 = vld [vmem:[#allocation6 + $0x44] ss:$8 sps:$4 sm:$0xff]   ;;  %v2631_v8 = vld [vmem:[#allocation6 + $0x40] ss:$8 sps:$4 sm:$0xff]  }
 0xc53   :  { %v1210_v62 = vpop.f32.mrf.mxu1  ;;  %v2634_v17 = vld [vmem:[#allocation6 + $0x34] ss:$8 sps:$4 sm:$0xff]  }
 0xc54   :  { %v1730_v41 = vmul.f32 -1.442695, %v1214_v3  ;;  %v2640_v62 = vld [vmem:[#allocation6 + $0x24] ss:$8 sps:$4 sm:$0xff]  }
 0xc55   :  { %v1211_v21 = vpop.f32.mrf.mxu1 }
 0xc56   :  { %v2643_v21 = vld [vmem:[#allocation6 + $0x20] ss:$8 sps:$4 sm:$0xff]  }
 0xc5c   :  { %v1891_v42 = vpop.eup %1890 }
 0xc5d   :  { %1006 = vrot.lane.b32.xlu0 %v1891_v42, %s2054_s2  ;;  %v1893_v57 = vpop.eup %1892  ;;  %v2646_v42 = vld [vmem:[#allocation6 + $0x14] ss:$8 sps:$4 sm:$0xff]  }
 0xc5e   :  { %v987_v30 = vadd.f32 1.0, %v1893_v57  ;;  %v2652_v57 = vld [vmem:[#allocation6 + $0x4] ss:$8 sps:$4 sm:$0xff]  }
 0xc60   :  { %1894 = vrcp.f32 %v987_v30 }
 0xc61   :  { %1896 = vtanh.f32 %v1214_v3  ;;  %v2637_v3 = vld [vmem:[#allocation6 + $0x30] ss:$8 sps:$4 sm:$0xff]  }
 0xc62   :  { %1898 = vpow2.f32 %v1729_v24 }
 0xc6d   :  { %v1895_v51 = vpop.eup %1894 }
 0xc6e   :  { %v1897_v31 = vpop.eup %1896 }
 0xc6f   :  { %v1899_v28 = vpop.eup %1898 }
 0xc70   :  { %v1221_v61 = vadd.f32 1.0, %v1899_v28 }
 0xc72   :  { %1900 = vrcp.f32 %v1221_v61 }
 0xc7f   :  { %v1901_v26 = vpop.eup %1900 }
 0xc80   :  { %v1228_v12 = vmul.f32 %v1901_v26, %v2505_v48 }
 0xccf   :  { %v1007_v54 = vpop.permute.xlu0 %1006 }
 0xcd0   :  { %v1009_v20 = vmul.f32 %v1895_v51, %v1007_v54 }
 0xcd2   :  { %1090 = vrot.lane.b32.xlu0 %v1009_v20, %s2054_s2 }
 0xcd6   :  { %1230 = vrot.lane.b32.xlu0 %v1897_v31, %s2054_s2 }
 0xd44   :  { %v1091_v25 = vpop.permute.xlu0 %1090 }
 0xd45   :  { %v1093_v23 = vsel %vm301_vm1, %v2511_v0, %v1091_v25 }
 0xd46   :  { %v1094_v29 = vpack.c.bf16 %v1093_v23, %v1093_v23  ;;  %v208_v23 = vadd.f32 %v2335_v32, %v2174_v18 }
 0xd48   :  { %v1231_v27 = vpop.permute.xlu0 %1230  ;;  %1128 = vmatmul.mubr.bf16.vlgmr.msra.gmra.mxu0 %v1094_v29 }
 0xd49   :  { %v1233_v10 = vmul.f32 %v1901_v26, %v1231_v27  ;;  %1337 = vmatpush1.bf16.msra.mxu0 %v2553_v16  ;;  %1360 = vmatprep.mubr.bf16.mxu0 %v2053_v2  ;;  %v210_v26 = vadd.f32 %v2337_v33, %v2180_v22 }
 0xd4a   :  { %1338 = vmatprep.subr.bf16.mxu0 %v2560_v4 }
 0xd4b   :  { %1235 = vrot.lane.b32.xlu0 %v1233_v10, %s2054_s2 }
 0xd4d   :  { %1339 = vmatpush1.bf16.msra.mxu0 %v2567_v15 }
 0xd4e   :  { %1340 = vmatprep.subr.bf16.mxu0 %v2573_v5 }
 0xd51   :  { %1341 = vmatpush1.bf16.msra.mxu0 %v2579_v6 }
 0xd52   :  { %1342 = vmatprep.subr.bf16.mxu0 %v2585_v7 }
 0xd55   :  { %1343 = vmatpush1.bf16.msra.mxu0 %v2591_v11 }
 0xd56   :  { %1407 = vmatprep.subr.bf16.mxu0 %v2594_v36 }
 0xdbd   :  { %v1236_v13 = vpop.permute.xlu0 %1235 }
 0xdbe   :  { %v2598_v1 = vadd.f32 %v1236_v13, %v1228_v12 }
 0xdc0   :  { %1902 = vtanh.f32 %v2598_v1 }
 0xdcd   :  { %v1903_v38 = vpop.eup %1902 }
 0xdce   :  { %1241 = vrot.lane.b32.xlu0 %v1903_v38, %s2054_s2 }
 0xe08   :  { %v1129_v9 = vpop.f32.mrf.mxu0 }
 0xe09   :  { %v1130_v30 = vadd.f32 %v1129_v9, %v2357_v14 }
 0xe0a   :  { %v1131_v19 = vpop.f32.mrf.mxu0 }
 0xe0b   :  { %v2603_v40 = vadd.f32 %v1131_v19, %v2348_v37  ;;  %v1726_v51 = vmul.f32 -1.442695, %v1130_v30 }
 0xe0c   :  { %v1133_v0 = vpop.f32.mrf.mxu0 }
 0xe0d   :  { %1904 = vtanh.f32 %v2603_v40 }
 0xe0e   :  { %v1134_v60 = vpop.f32.mrf.mxu0  ;;  %1906 = vpow2.f32 %v1730_v41 }
 0xe1a   :  { %v1905_v39 = vpop.eup %1904 }
 0xe1b   :  { %1151 = vrot.lane.b32.xlu1 %v1905_v39, %s2054_s2  ;;  %v1907_v48 = vpop.eup %1906 }
 0xe1c   :  { %v1222_v43 = vadd.f32 1.0, %v1907_v48 }
 0xe1e   :  { %1908 = vrcp.f32 %v1222_v43 }
 0xe1f   :  { %1910 = vpow2.f32 %v1726_v51 }
 0xe2b   :  { %v1909_v44 = vpop.eup %1908 }
 0xe2c   :  { %v1911_v54 = vpop.eup %1910 }
 0xe2d   :  { %v1142_v20 = vadd.f32 1.0, %v1911_v54 }
 0xe2f   :  { %1912 = vrcp.f32 %v1142_v20 }
 0xe3c   :  { %v1913_v31 = vpop.eup %1912 }
 0xe3d   :  { %v1149_v61 = vmul.f32 %v1913_v31, %v2540_v56  ;;  %v1727_v56 = vmul.f32 -1.442695, %v2603_v40 }
 0xe40   :  { %v1242_v46 = vpop.permute.xlu0 %1241 }
 0xe41   :  { %v2607_v47 = vmul.f32 %v1909_v44, %v1242_v46 }
 0xe43   :  { %v1324_v49 = vpack.c.bf16 %v2607_v47, %v2607_v47 }
 0xe45   :  { %1733 = vmatmul.mubr.msk.bf16.vlgmr.msra.gmra.mxu0 %vm301_vm1, %v1324_v49 }
 0xe46   :  { %1408 = vmatpush1.bf16.msra.mxu0 %v2612_v50  ;;  %1439 = vmatprep.mubr.bf16.mxu0 %v2053_v2 }
 0xe47   :  { %1409 = vmatprep.subr.bf16.mxu0 %v2616_v52 }
 0xe4a   :  { %1410 = vmatpush1.bf16.msra.mxu0 %v2619_v53 }
 0xe4b   :  { %1411 = vmatprep.subr.bf16.mxu0 %v2622_v55 }
 0xe4e   :  { %1412 = vmatpush1.bf16.msra.mxu0 %v2625_v58 }
 0xe4f   :  { %1413 = vmatprep.subr.bf16.mxu0 %v2628_v59 }
 0xe52   :  { %1414 = vmatpush1.bf16.msra.mxu0 %v2631_v8 }
 0xe53   :  { %1415 = vmatprep.subr.bf16.mxu0 %v2634_v17 }
 0xe56   :  { %1416 = vmatpush1.bf16.msra.mxu0 %v2637_v3 }
 0xe57   :  { %1417 = vmatprep.subr.bf16.mxu0 %v2640_v62 }
 0xe5a   :  { %1418 = vmatpush1.bf16.msra.mxu0 %v2643_v21 }
 0xe5b   :  { %1419 = vmatprep.subr.bf16.mxu0 %v2646_v42 }
 0xe5e   :  { %1420 = vmatpush1.bf16.msra.mxu0 %v2649_v45 }
 0xe5f   :  { %1421 = vmatprep.subr.bf16.mxu0 %v2652_v57 }
 0xe62   :  { %1422 = vmatpush1.bf16.msra.mxu0 %v2289_v63 }
 0xe8d   :  { %v1152_v24 = vpop.permute.xlu1 %1151 }
 0xe8e   :  { %v1154_v28 = vmul.f32 %v1913_v31, %v1152_v24 }
 0xe90   :  { %1156 = vrot.lane.b32.xlu1 %v1154_v28, %s2054_s2 }
 0xf02   :  { %v1157_v25 = vpop.permute.xlu1 %1156 }
 0xf03   :  { %v2661_v29 = vadd.f32 %v1157_v25, %v1149_v61 }
 0xf05   :  { %v1362_v63 = vpop.f32.mrf.mxu0  ;;  %1914 = vtanh.f32 %v2661_v29 }
 0xf06   :  { %v1369_v27 = vadd.f32 %v1362_v63, %v208_v23  ;;  %1916 = vpow2.f32 %v1727_v56 }
 0xf07   :  { %v1364_v10 = vpop.f32.mrf.mxu0 }
 0xf08   :  { %v1370_v12 = vadd.f32 %v1364_v10, %v210_v26  ;;  %v1734_v41 = vmul.f32 -1.442695, %v1369_v27 }
 0xf09   :  { %v1366_v13 = vpop.f32.mrf.mxu0 }
 0xf0a   :  { %v1735_v31 = vmul.f32 -1.442695, %v1370_v12 }
 0xf0b   :  { %v1367_v38 = vpop.f32.mrf.mxu0 }
 0xf12   :  { %v1915_v9 = vpop.eup %1914 }
 0xf13   :  { %1162 = vrot.lane.b32.xlu1 %v1915_v9, %s2054_s2  ;;  %v1917_v32 = vpop.eup %1916 }
 0xf14   :  { %v1143_v19 = vadd.f32 1.0, %v1917_v32 }
 0xf16   :  { %1918 = vrcp.f32 %v1143_v19 }
 0xf17   :  { %1920 = vtanh.f32 %v1370_v12 }
 0xf18   :  { %1922 = vpow2.f32 %v1734_v41 }
 0xf23   :  { %v1919_v0 = vpop.eup %1918 }
 0xf24   :  { %v1921_v39 = vpop.eup %1920 }
 0xf25   :  { %v1923_v48 = vpop.eup %1922 }
 0xf26   :  { %v1377_v43 = vadd.f32 1.0, %v1923_v48 }
 0xf28   :  { %1924 = vrcp.f32 %v1377_v43 }
 0xf35   :  { %v1925_v49 = vpop.eup %1924 }
 0xf85   :  { %v1163_v60 = vpop.permute.xlu1 %1162 }
 0xf86   :  { %v1165_v33 = vmul.f32 %v1919_v0, %v1163_v60 }
 0xf88   :  { %1246 = vrot.lane.b32.xlu1 %v1165_v33, %s2054_s2 }
 0xf8c   :  { %1386 = vrot.lane.b32.xlu1 %v1921_v39, %s2054_s2 }
 0xffa   :  { %v1247_v44 = vpop.permute.xlu1 %1246 }
 0xffb   :  { %v1249_v40 = vsel %vm301_vm1, %v2607_v47, %v1247_v44 }
 0xffc   :  { %v1250_v46 = vpack.c.bf16 %v1249_v40, %v1249_v40 }
 0xffe   :  { %1284 = vmatmul.mubr.bf16.vlgmr.msra.gmra.mxu1 %v1250_v46  ;;  %v1387_v30 = vpop.permute.xlu1 %1386 }
 0xfff   :  { %v1389_v51 = vmul.f32 %v1925_v49, %v1387_v30  ;;  %1493 = vmatpush1.bf16.msra.mxu1 %v2553_v16  ;;  %1516 = vmatprep.mubr.bf16.mxu1 %v2053_v2  ;;  %v1384_v16 = vmul.f32 %v1925_v49, %v2598_v1 }
0x1000   :  { %1494 = vmatprep.subr.bf16.mxu1 %v2560_v4 }
0x1001   :  { %1391 = vrot.lane.b32.xlu1 %v1389_v51, %s2054_s2 }
0x1003   :  { %1495 = vmatpush1.bf16.msra.mxu1 %v2567_v15 }
0x1004   :  { %1496 = vmatprep.subr.bf16.mxu1 %v2573_v5 }
0x1007   :  { %1497 = vmatpush1.bf16.msra.mxu1 %v2579_v6 }
0x1008   :  { %1498 = vmatprep.subr.bf16.mxu1 %v2585_v7 }
0x100b   :  { %1499 = vmatpush1.bf16.msra.mxu1 %v2591_v11 }
0x100c   :  { %1563 = vmatprep.subr.bf16.mxu1 %v2594_v36 }
0x1073   :  { %v1392_v47 = vpop.permute.xlu1 %1391 }
0x1074   :  { %v2683_v54 = vadd.f32 %v1392_v47, %v1384_v16 }
0x1076   :  { %1926 = vtanh.f32 %v2683_v54 }
0x1083   :  { %v1927_v4 = vpop.eup %1926 }
0x1084   :  { %1397 = vrot.lane.b32.xlu1 %v1927_v4, %s2054_s2 }
0x10be   :  { %v1285_v15 = vpop.f32.mrf.mxu1 }
0x10c0   :  { %v1287_v5 = vpop.f32.mrf.mxu1 }
0x10c1   :  { %v1288_v6 = vadd.f32 %v1287_v5, %v2348_v37 }
0x10c2   :  { %v1289_v20 = vpop.f32.mrf.mxu1 }
0x10c3   :  { %1928 = vtanh.f32 %v1288_v6  ;;  %v1732_v27 = vmul.f32 -1.442695, %v1288_v6 }
0x10c4   :  { %v1290_v7 = vpop.f32.mrf.mxu1  ;;  %1930 = vpow2.f32 %v1735_v31 }
0x10d0   :  { %v1929_v11 = vpop.eup %1928 }
0x10d1   :  { %1307 = vrot.lane.b32.xlu0 %v1929_v11, %s2054_s2  ;;  %v1931_v36 = vpop.eup %1930 }
0x10d2   :  { %v1378_v1 = vadd.f32 1.0, %v1931_v36 }
0x10d4   :  { %1932 = vrcp.f32 %v1378_v1 }
0x10e1   :  { %v1933_v24 = vpop.eup %1932 }
0x10f6   :  { %v1398_v28 = vpop.permute.xlu1 %1397 }
0x10f7   :  { %v2689_v61 = vmul.f32 %v1933_v24, %v1398_v28 }
0x10f9   :  { %v1480_v25 = vpack.c.bf16 %v2689_v61, %v2689_v61 }
0x10fb   :  { %1738 = vmatmul.mubr.msk.bf16.vlgmr.msra.gmra.mxu1 %vm301_vm1, %v1480_v25 }
0x10fc   :  { %1564 = vmatpush1.bf16.msra.mxu1 %v2612_v50  ;;  %1595 = vmatprep.mubr.bf16.mxu1 %v2053_v2  ;;  %v2003_v2 = vld [vmem:[#allocation6] ss:$8 sps:$4 sm:$0xff]   ;;  %v1286_v50 = vadd.f32 %v1285_v15, %v2357_v14 }
0x10fd   :  { %1565 = vmatprep.subr.bf16.mxu1 %v2616_v52 }
0x10fe   :  { %v1731_v52 = vmul.f32 -1.442695, %v1286_v50 }
0x1100   :  { %1566 = vmatpush1.bf16.msra.mxu1 %v2619_v53  ;;  %1934 = vpow2.f32 %v1731_v52 }
0x1101   :  { %1567 = vmatprep.subr.bf16.mxu1 %v2622_v55 }
0x1104   :  { %1568 = vmatpush1.bf16.msra.mxu1 %v2625_v58 }
0x1105   :  { %1569 = vmatprep.subr.bf16.mxu1 %v2628_v59 }
0x1108   :  { %1570 = vmatpush1.bf16.msra.mxu1 %v2631_v8 }
0x1109   :  { %1571 = vmatprep.subr.bf16.mxu1 %v2634_v17 }
0x110c   :  { %1572 = vmatpush1.bf16.msra.mxu1 %v2637_v3 }
0x110d   :  { %1573 = vmatprep.subr.bf16.mxu1 %v2640_v62  ;;  %v1935_v53 = vpop.eup %1934  ;;  %v214_v62 = vadd.f32 %v2339_v34, %v2174_v18 }
0x110e   :  { %v1298_v55 = vadd.f32 1.0, %v1935_v53 }
0x1110   :  { %1574 = vmatpush1.bf16.msra.mxu1 %v2643_v21  ;;  %1936 = vrcp.f32 %v1298_v55 }
0x1111   :  { %1575 = vmatprep.subr.bf16.mxu1 %v2646_v42 }
0x1114   :  { %1576 = vmatpush1.bf16.msra.mxu1 %v2649_v45 }
0x1115   :  { %1577 = vmatprep.subr.bf16.mxu1 %v2652_v57 }
0x1118   :  { %1578 = vmatpush1.bf16.msra.mxu1 %v2003_v2 }
0x111d   :  { %v1937_v58 = vpop.eup %1936 }
0x111e   :  { %v1305_v17 = vmul.f32 %v1937_v58, %v2661_v29  ;;  %v216_v29 = vadd.f32 %v2341_v35, %v2180_v22 }
0x1143   :  { %v1308_v59 = vpop.permute.xlu0 %1307 }
0x1144   :  { %v1310_v8 = vmul.f32 %v1937_v58, %v1308_v59 }
0x1146   :  { %1312 = vrot.lane.b32.xlu0 %v1310_v8, %s2054_s2 }
0x11b8   :  { %v1313_v3 = vpop.permute.xlu0 %1312 }
0x11b9   :  { %v1315_v21 = vadd.f32 %v1313_v3, %v1305_v17 }
0x11bb   :  { %v1518_v42 = vpop.f32.mrf.mxu1  ;;  %1938 = vtanh.f32 %v1315_v21 }
0x11bc   :  { %v1525_v45 = vadd.f32 %v1518_v42, %v214_v62  ;;  %1940 = vpow2.f32 %v1732_v27 }
0x11bd   :  { %v1520_v57 = vpop.f32.mrf.mxu1 }
0x11be   :  { %v1526_v13 = vadd.f32 %v1520_v57, %v216_v29  ;;  %v1739_v56 = vmul.f32 -1.442695, %v1525_v45 }
0x11bf   :  { %v1522_v23 = vpop.f32.mrf.mxu1 }
0x11c0   :  { %v1740_v50 = vmul.f32 -1.442695, %v1526_v13 }
0x11c1   :  { %v1523_v63 = vpop.f32.mrf.mxu1 }
0x11c8   :  { %v1939_v26 = vpop.eup %1938 }
0x11c9   :  { %1318 = vrot.lane.b32.xlu0 %v1939_v26, %s2054_s2  ;;  %v1941_v10 = vpop.eup %1940 }
0x11ca   :  { %v1299_v12 = vadd.f32 1.0, %v1941_v10 }
0x11cc   :  { %1942 = vrcp.f32 %v1299_v12 }
0x11cd   :  { %1944 = vtanh.f32 %v1526_v13 }
0x11ce   :  { %1946 = vpow2.f32 %v1739_v56 }
0x11d9   :  { %v1943_v18 = vpop.eup %1942 }
0x11da   :  { %v1945_v9 = vpop.eup %1944 }
0x11db   :  { %v1947_v32 = vpop.eup %1946 }
0x11dc   :  { %v1533_v19 = vadd.f32 1.0, %v1947_v32 }
0x11de   :  { %1948 = vrcp.f32 %v1533_v19 }
0x11eb   :  { %v1949_v60 = vpop.eup %1948 }
0x11ec   :  { %v1540_v41 = vmul.f32 %v1949_v60, %v2683_v54 }
0x123b   :  { %v1319_v34 = vpop.permute.xlu0 %1318 }
0x123c   :  { %v1321_v38 = vmul.f32 %v1943_v18, %v1319_v34 }
0x123e   :  { %1402 = vrot.lane.b32.xlu0 %v1321_v38, %s2054_s2 }
0x1242   :  { %1542 = vrot.lane.b32.xlu0 %v1945_v9, %s2054_s2 }
0x12b0   :  { %v1403_v0 = vpop.permute.xlu0 %1402 }
0x12b1   :  { %v1405_v22 = vsel %vm301_vm1, %v2689_v61, %v1403_v0 }
0x12b2   :  { %v1406_v35 = vpack.c.bf16 %v1405_v22, %v1405_v22 }
0x12b4   :  { %v1543_v33 = vpop.permute.xlu0 %1542  ;;  %1440 = vmatmul.mubr.bf16.vlgmr.msra.gmra.mxu0 %v1406_v35 }
0x12b5   :  { %v1545_v39 = vmul.f32 %v1949_v60, %v1543_v33 }
0x12b7   :  { %1547 = vrot.lane.b32.xlu0 %v1545_v39, %s2054_s2 }
0x1329   :  { %v1548_v48 = vpop.permute.xlu0 %1547 }
0x132a   :  { %v1550_v43 = vadd.f32 %v1548_v48, %v1540_v41 }
0x132c   :  { %1950 = vtanh.f32 %v1550_v43  ;;  %v1744_v43 = vld [vmem:[#allocation3] ss:$0 sm:$0xff] }
0x1339   :  { %v1951_v44 = vpop.eup %1950 }
0x133a   :  { %1553 = vrot.lane.b32.xlu0 %v1951_v44, %s2054_s2 }
0x1374   :  { %v1441_v40 = vpop.f32.mrf.mxu0 }
0x1375   :  { %v1442_v47 = vadd.f32 %v1441_v40, %v2357_v14 }
0x1376   :  { %v1443_v46 = vpop.f32.mrf.mxu0 }
0x1377   :  { %v1444_v49 = vadd.f32 %v1443_v46, %v2348_v37  ;;  %v1736_v4 = vmul.f32 -1.442695, %v1442_v47 }
0x1378   :  { %v1445_v30 = vpop.f32.mrf.mxu0 }
0x1379   :  { %1952 = vtanh.f32 %v1444_v49  ;;  %v1737_v1 = vmul.f32 -1.442695, %v1444_v49 }
0x137a   :  { %v1446_v51 = vpop.f32.mrf.mxu0  ;;  %1954 = vpow2.f32 %v1736_v4 }
0x1386   :  { %v1953_v16 = vpop.eup %1952 }
0x1387   :  { %1463 = vrot.lane.b32.xlu1 %v1953_v16, %s2054_s2  ;;  %v1955_v54 = vpop.eup %1954 }
0x1388   :  { %v1454_v15 = vadd.f32 1.0, %v1955_v54 }
0x138a   :  { %1956 = vrcp.f32 %v1454_v15 }
0x1397   :  { %v1957_v5 = vpop.eup %1956 }
0x1398   :  { %v1461_v7 = vmul.f32 %v1957_v5, %v1315_v21 }
0x13ac   :  { %v1554_v55 = vpop.permute.xlu0 %1553 }
0x13f9   :  { %v1464_v6 = vpop.permute.xlu1 %1463 }
0x13fa   :  { %v1466_v20 = vmul.f32 %v1957_v5, %v1464_v6 }
0x13fc   :  { %1468 = vrot.lane.b32.xlu1 %v1466_v20, %s2054_s2 }
0x146e   :  { %v1469_v11 = vpop.permute.xlu1 %1468 }
0x146f   :  { %v1471_v31 = vadd.f32 %v1469_v11, %v1461_v7 }
0x1471   :  { %1958 = vtanh.f32 %v1471_v31 }
0x1472   :  { %1960 = vpow2.f32 %v1737_v1 }
0x147e   :  { %v1959_v36 = vpop.eup %1958 }
0x147f   :  { %1474 = vrot.lane.b32.xlu1 %v1959_v36, %s2054_s2  ;;  %v1961_v24 = vpop.eup %1960 }
0x1480   :  { %v1455_v28 = vadd.f32 1.0, %v1961_v24 }
0x1482   :  { %1962 = vrcp.f32 %v1455_v28 }
0x1483   :  { %1964 = vpow2.f32 %v1740_v50 }
0x148f   :  { %v1963_v61 = vpop.eup %1962 }
0x1490   :  { %v1965_v52 = vpop.eup %1964 }
0x1491   :  { %v1534_v53 = vadd.f32 1.0, %v1965_v52 }
0x1493   :  { %1966 = vrcp.f32 %v1534_v53 }
0x14a0   :  { %v1967_v58 = vpop.eup %1966 }
0x14a1   :  { %v1556_v59 = vmul.f32 %v1967_v58, %v1554_v55 }
0x14f1   :  { %v1475_v25 = vpop.permute.xlu1 %1474 }
0x14f2   :  { %v1477_v2 = vmul.f32 %v1963_v61, %v1475_v25 }
0x14f4   :  { %1558 = vrot.lane.b32.xlu1 %v1477_v2, %s2054_s2 }
0x1566   :  { %v1559_v8 = vpop.permute.xlu1 %1558 }
0x1567   :  { %v1561_v17 = vsel %vm301_vm1, %v1556_v59, %v1559_v8 }
0x1568   :  { %v1562_v3 = vpack.c.bf16 %v1561_v17, %v1561_v17 }
0x156a   :  { %1596 = vmatmul.mubr.bf16.vlgmr.msra.gmra.mxu1 %v1562_v3 }
0x162a   :  { %v1597_v62 = vpop.f32.mrf.mxu1 }
0x162b   :  { %v1598_v63 = vadd.f32 %v1597_v62, %v2357_v14 }
0x162c   :  { %v1599_v21 = vpop.f32.mrf.mxu1 }
0x162d   :  { %v1600_v42 = vadd.f32 %v1599_v21, %v2348_v37  ;;  %v1741_v26 = vmul.f32 -1.442695, %v1598_v63  ;;  %v1743_v37 = vld [vmem:[%s2751_s6] ss:$0 sm:$0xff] }
0x162e   :  { %v1601_v45 = vpop.f32.mrf.mxu1  ;;  %v1641_v9 = vmul.f32 %v1743_v37, %v1556_v59 }
0x162f   :  { %1968 = vtanh.f32 %v1600_v42  ;;  %v1742_v32 = vmul.f32 -1.442695, %v1600_v42 }
0x1630   :  { %v1602_v57 = vpop.f32.mrf.mxu1  ;;  %1970 = vpow2.f32 %v1741_v26  ;;  %v1642_v56 = vsel %vm301_vm1, %v1641_v9, 0.0 }
0x163c   :  { %v1969_v23 = vpop.eup %1968 }
0x163d   :  { %1619 = vrot.lane.b32.xlu0 %v1969_v23, %s2054_s2  ;;  %v1971_v27 = vpop.eup %1970 }
0x163e   :  { %v1610_v10 = vadd.f32 1.0, %v1971_v27 }
0x1640   :  { %1972 = vrcp.f32 %v1610_v10 }
0x164d   :  { %v1973_v12 = vpop.eup %1972 }
0x164e   :  { %v1617_v18 = vmul.f32 %v1973_v12, %v1471_v31 }
0x16af   :  { %v1620_v29 = vpop.permute.xlu0 %1619 }
0x16b0   :  { %v1622_v13 = vmul.f32 %v1973_v12, %v1620_v29 }
0x16b2   :  { %1624 = vrot.lane.b32.xlu1 %v1622_v13, %s2054_s2 }
0x16b6   :  { %1645 = vrot.lane.b32.xlu1 %v1743_v37, %s2054_s2 }
0x1724   :  { %v1625_v34 = vpop.permute.xlu1 %1624 }
0x1725   :  { %v1627_v38 = vadd.f32 %v1625_v34, %v1617_v18 }
0x1727   :  { %1974 = vtanh.f32 %v1627_v38 }
0x1728   :  { %1976 = vpow2.f32 %v1742_v32  ;;  %v1646_v60 = vpop.permute.xlu1 %1645 }
0x1734   :  { %v1975_v14 = vpop.eup %1974 }
0x1735   :  { %1630 = vrot.lane.b32.xlu0 %v1975_v14, %s2054_s2  ;;  %v1977_v19 = vpop.eup %1976 }
0x1736   :  { %v1611_v0 = vadd.f32 1.0, %v1977_v19 }
0x1738   :  { %1978 = vrcp.f32 %v1611_v0 }
0x1745   :  { %v1979_v22 = vpop.eup %1978 }
0x1754   :  { %1643 = vadd.xlane.f32.xlu0 %v1642_v56 }
0x17a7   :  { %v1631_v35 = vpop.permute.xlu0 %1630 }
0x17a8   :  { %v1633_v33 = vmul.f32 %v1979_v22, %v1631_v35 }
0x17aa   :  { %v1648_v39 = vmul.f32 %v1646_v60, %v1633_v33 }
0x17ac   :  { %v1649_v41 = vsel %vm301_vm1, %v1648_v39, 0.0 }
0x17ad   :  { %1650 = vadd.xlane.f32.xlu1 %v1649_v41 }
0x17dd   :  { %v1644_v48 = vpop.xlane.xlu0 %1643 }
0x1836   :  { %v1651_v44 = vpop.xlane.xlu1 %1650 }
0x1837   :  { %v1652_v40 = vadd.f32 %v1651_v44, %v1644_v48 }
0x1839   :  { %v1660_v46 = vadd.f32 %v1744_v43, %v1652_v40 }
0x183b   :  { %1662 = vst.msk [vmem:[%s2753_s8] sm:$0xff] %vm1661_vm3, %v1660_v46 }
0x183c   :  { %1667 = vsyncpa [#allocation5], 1 }
0x183d   :  { %1668 = vsyncpa [#allocation7], 1 }

</bundles_post_ra>
